<compile_context>
chip_gen: v6e
topology: v6e:2x2x1
jax: 0.10.0
libtpu: 0.0.40
codegen_flags: <defaults>
</compile_context>

<pallas_src>
import functools

import jax
import jax.numpy as jnp
from jax.experimental import pallas as pl
from jax.experimental.pallas import tpu as pltpu


def _num_tensorcores_per_chip():
    """2 on v7x (megacore split of 'parallel' axes), 1 on v5e/v6e."""
    try:
        kind = jax.devices()[0].device_kind.lower()
    except Exception:
        return 1
    return 2 if ("v7" in kind or "7x" in kind) else 1


def _pick_tile(n, preferred):
    """Largest tile <= preferred that divides n and is 128-aligned (or == n)."""
    t = min(preferred, n)
    if n % t == 0 and (t == n or t % 128 == 0):
        return t
    best = None
    d = 128
    while d <= min(preferred, n):
        if n % d == 0:
            best = d
        d += 128
    return best if best is not None else n


def _max_avg_kernel(f1_ref, f2_ref, f2sum_ref, max_ref, avg_ref,
                    f1t_sc, max_sc, *, inv_n2, n_strips, strip, matmul_dtype):
    """One (batch, img1-tile, img2-tile) grid step.

    f1_ref   : (1, C, tn1)   resident tile of img1 pixels (original dtype)
    f2_ref   : (1, C, tn2)   streamed tile of img2 pixels (matmul dtype)
    f2sum_ref: (1, 1, C)     f32 per-batch column sum of the ORIGINAL img2
    max_ref  : (1, 1, tn1)   per-pixel max  (written on last j)
    avg_ref  : (1, 1, tn1)   per-pixel mean (written on last j)
    f1t_sc   : (tn1, C)      transposed + downcast resident img1 tile
    max_sc   : (tn1, strip)  f32 running element-wise max accumulator
    """
    j = pl.program_id(2)

    @pl.when(j == 0)
    def _():
        # Hoisted once per (b, i) tile: transpose + downcast the resident img1
        # tile so every inner step is a standard (M,K)x(K,N) matmul with no
        # per-step XLU transpose and no per-step VPU cast.
        f1t_sc[...] = f1_ref[0].T.astype(matmul_dtype)
        max_sc[...] = jnp.full_like(max_sc, -jnp.inf)

    f1t = f1t_sc[...]                      # (tn1, C)
    f2 = f2_ref[0]                         # (C, tn2)

    # Per-strip sub-matmuls; each (tn1, strip) result is consumed by the VPU
    # max immediately.  Tree-reassociated so the dependence chain stays short;
    # the running-max accumulator is read-modify-written exactly once per step.
    parts = [
        jnp.dot(f1t, f2[:, s * strip:(s + 1) * strip],
                preferred_element_type=jnp.float32)
        for s in range(n_strips)
    ]
    while len(parts) > 1:
        nxt = [jnp.maximum(parts[k], parts[k + 1])
               for k in range(0, len(parts) - 1, 2)]
        if len(parts) % 2:
            nxt.append(parts[-1])
        parts = nxt
    max_sc[...] = jnp.maximum(max_sc[...], parts[0])

    @pl.when(j == pl.num_programs(2) - 1)
    def _():
        # Single cross-lane max reduce per (b, i) tile.
        mx = jnp.max(max_sc[...], axis=-1)                          # (tn1,)
        max_ref[...] = mx[None, None, :].astype(max_ref.dtype)
        # Analytic average in full precision from the ORIGINAL-dtype f1 tile:
        # avg_i = <f1_i, sum_j f2_j> / N2 (mathematically identical to the
        # reference mean, different summation order only).
        av = jnp.dot(f2sum_ref[0], f1_ref[0].astype(jnp.float32),
                     preferred_element_type=jnp.float32)            # (1, tn1)
        avg_ref[...] = (av * inv_n2)[None].astype(avg_ref.dtype)


def compute_max_avg(img1_features_l0, img2_features_lk, *, tn1=2048, tn2=512,
                    matmul_dtype=jnp.bfloat16):
    """Pallas equivalent of ComputeMaxAvgFunction.apply (forward).

    img1_features_l0: (B, C, H1, W1)   NCHW
    img2_features_lk: (B, C, H2, W2)   NCHW
    returns         : (B, 2, H1, W1)   [:, 0] = max corr, [:, 1] = avg corr

    matmul_dtype=jnp.bfloat16 (default) runs the correlation matmul at bf16
    MXU rate with f32 accumulation; the max channel sees bf16 rounding of the
    inputs (argmax ties may flip), the avg channel stays full precision.
    Pass matmul_dtype=jnp.float32 for bit-faithful f32 correlations.
    """
    B, C, H1, W1 = img1_features_l0.shape
    B2, C2, H2, W2 = img2_features_lk.shape
    assert B == B2 and C == C2

    N1, N2 = H1 * W1, H2 * W2
    tn1 = _pick_tile(N1, tn1)
    tn2 = _pick_tile(N2, tn2)

    # Megacore occupancy: only split the resident img1 tile when there is a
    # second TensorCore to feed (v7x); on 1-TC chips halving tn1 just doubles
    # the f2 restream.
    if _num_tensorcores_per_chip() >= 2:
        while (B * (N1 // tn1) < 2 and tn1 % 2 == 0 and (tn1 // 2) % 128 == 0
               and N1 % (tn1 // 2) == 0):
            tn1 //= 2

    assert N1 % tn1 == 0 and (tn1 == N1 or tn1 % 128 == 0), (N1, tn1)
    assert N2 % tn2 == 0 and (tn2 == N2 or tn2 % 128 == 0), (N2, tn2)

    strip = 128 if tn2 % 128 == 0 else tn2
    n_strips = tn2 // strip

    mm_dtype = jnp.dtype(matmul_dtype)
    out_dtype = img1_features_l0.dtype

    # Zero-cost layout glue: NCHW -> (B, C, N) flattened pixels (pure reshape,
    # no HBM transpose pass).
    f1 = img1_features_l0.reshape(B, C, N1)          # original dtype, read once
    f2 = img2_features_lk.reshape(B, C, N2)
    # Column sum of the ORIGINAL img2 (f32) for the exact analytic average.
    f2sum = jnp.sum(f2.astype(jnp.float32), axis=2).reshape(B, 1, C)
    # Cast the re-streamed operand in HBM: halves its DMA bytes + bf16 MXU rate.
    f2_mm = f2.astype(mm_dtype)

    kernel = functools.partial(
        _max_avg_kernel, inv_n2=1.0 / N2, n_strips=n_strips, strip=strip,
        matmul_dtype=mm_dtype)

    n_i = N1 // tn1
    bytes_accessed = int(
        B * C * N1 * jnp.dtype(f1.dtype).itemsize          # f1 read once
        + B * C * N2 * mm_dtype.itemsize * n_i             # f2 re-streamed
        + B * C * 4                                        # f2sum
        + 2 * B * N1 * jnp.dtype(out_dtype).itemsize)      # outputs
    cost = pl.CostEstimate(flops=int(2 * B * N1 * N2 * C),
                           transcendentals=0,
                           bytes_accessed=bytes_accessed)

    mx, av = pl.pallas_call(
        kernel,
        out_shape=(jax.ShapeDtypeStruct((B, 1, N1), out_dtype),
                   jax.ShapeDtypeStruct((B, 1, N1), out_dtype)),
        grid_spec=pltpu.PrefetchScalarGridSpec(
            num_scalar_prefetch=0,
            grid=(B, n_i, N2 // tn2),
            in_specs=[
                pl.BlockSpec((1, C, tn1), lambda b, i, j: (b, 0, i)),
                pl.BlockSpec((1, C, tn2), lambda b, i, j: (b, 0, j)),
                pl.BlockSpec((1, 1, C), lambda b, i, j: (b, 0, 0)),
            ],
            out_specs=[
                pl.BlockSpec((1, 1, tn1), lambda b, i, j: (b, 0, i)),
                pl.BlockSpec((1, 1, tn1), lambda b, i, j: (b, 0, i)),
            ],
            scratch_shapes=[
                pltpu.VMEM((tn1, C), mm_dtype),        # transposed f1 tile
                pltpu.VMEM((tn1, strip), jnp.float32),  # running max
            ],
        ),
        compiler_params=pltpu.CompilerParams(
            dimension_semantics=("parallel", "parallel", "arbitrary"),
            # <= 48 MiB: safe under v7x's 64 MiB physical VMEM while lifting
            # the 16/32 MiB scoped defaults on v5e/v6e for the larger tiles.
            vmem_limit_bytes=48 * 1024 * 1024,
        ),
        cost_estimate=cost,
    )(f1, f2_mm, f2sum)

    # (B,1,N1)+(B,1,N1) -> (B,2,H1,W1): concat + reshape, no transpose.
    return jnp.concatenate([mx, av], axis=1).reshape(B, 2, H1, W1)


def _reference(img1, img2):
    B, C, H1, W1 = img1.shape
    _, _, H2, W2 = img2.shape
    f1 = img1.reshape(B, C, H1 * W1).astype(jnp.float32)
    f2 = img2.reshape(B, C, H2 * W2).astype(jnp.float32)
    corr = jnp.einsum("bci,bcj->bij", f1, f2)
    mx = corr.max(axis=-1)
    av = corr.mean(axis=-1)
    return jnp.stack([mx, av], axis=1).reshape(B, 2, H1, W1)


if __name__ == "__main__":
    key = jax.random.PRNGKey(0)

    # Test 1: square shapes consistent with the module's forward (NCHW).
    B, C, H, W = 2, 32, 16, 16
    k1, k2, k3, k4 = jax.random.split(key, 4)
    img1 = jax.random.normal(k1, (B, C, H, W), dtype=jnp.float32)
    img2 = jax.random.normal(k2, (B, C, H, W), dtype=jnp.float32)
    ref = _reference(img1, img2)

    # Default fast path: bf16 correlation matmul (f32 accumulation); max channel
    # sees bf16 rounding, avg channel stays full precision.
    out = jax.block_until_ready(compute_max_avg(img1, img2))
    assert out.shape == (B, 2, H, W)
    assert jnp.allclose(out, ref, atol=2e-1, rtol=5e-2)
    # Avg channel is computed exactly (f32), check it tightly.
    assert jnp.allclose(out[:, 1], ref[:, 1], atol=2e-3, rtol=2e-3)

    # Exact path: f32 correlation matmul.
    out_f32 = jax.block_until_ready(
        compute_max_avg(img1, img2, matmul_dtype=jnp.float32))
    assert out_f32.shape == (B, 2, H, W)
    assert jnp.allclose(out_f32, ref, atol=2e-3, rtol=2e-3)

    # Test 2: asymmetric img2 so the reduction axis (j) has multiple grid steps.
    img1b = jax.random.normal(k3, (1, 32, 16, 16), dtype=jnp.float32)
    img2b = jax.random.normal(k4, (1, 32, 32, 32), dtype=jnp.float32)
    refb = _reference(img1b, img2b)
    outb = jax.block_until_ready(compute_max_avg(img1b, img2b))
    assert outb.shape == (1, 2, 16, 16)
    assert jnp.allclose(outb, refb, atol=2e-1, rtol=5e-2)
    assert jnp.allclose(outb[:, 1], refb[:, 1], atol=2e-3, rtol=2e-3)

    print("KERNEL_OK")
</pallas_src>

<mosaic_0001>
module attributes {stable_mosaic.version = 11 : i64} {
  func.func @_max_avg_kernel(%arg0: i32, %arg1: i32, %arg2: i32, %arg3: memref<1x32x256xf32, #tpu.memory_space<vmem>>, %arg4: memref<1x32x256xbf16, #tpu.memory_space<vmem>>, %arg5: memref<1x1x32xf32, #tpu.memory_space<vmem>>, %arg6: memref<1x1x256xf32, #tpu.memory_space<vmem>>, %arg7: memref<1x1x256xf32, #tpu.memory_space<vmem>>, %arg8: memref<256x32xbf16, #tpu.memory_space<vmem>>, %arg9: memref<256x128xf32, #tpu.memory_space<vmem>>) attributes {dimension_semantics = [#tpu.dimension_semantics<parallel>, #tpu.dimension_semantics<parallel>, #tpu.dimension_semantics<arbitrary>], iteration_bounds = array<i64: 2, 1, 1>, scalar_prefetch = 0 : i64, scratch_operands = 2 : i64, tpu.core_type = #tpu.core_type<tc>, window_params = [{transform_indices = @transform_0, window_bounds = array<i64: 1, 32, 256>}, {transform_indices = @transform_1, window_bounds = array<i64: 1, 32, 256>}, {transform_indices = @transform_2, window_bounds = array<i64: 1, 1, 32>}, {transform_indices = @transform_3, window_bounds = array<i64: 1, 1, 256>}, {transform_indices = @transform_4, window_bounds = array<i64: 1, 1, 256>}]} {
    %c0_i32 = arith.constant 0 : i32
    %0 = arith.cmpi eq, %arg2, %c0_i32 : i32
    %1 = arith.extui %0 : i1 to i32
    %c0_i32_0 = arith.constant 0 : i32
    %2 = arith.cmpi ne, %1, %c0_i32_0 : i32
    scf.if %2 {
      %c0_12 = arith.constant 0 : index
      %c0_13 = arith.constant 0 : index
      %c0_14 = arith.constant 0 : index
      %17 = vector.load %arg3[%c0_12, %c0_13, %c0_14] : memref<1x32x256xf32, #tpu.memory_space<vmem>>, vector<1x32x256xf32>
      %18 = vector.shape_cast %17 : vector<1x32x256xf32> to vector<32x256xf32>
      %19 = tpu.transpose %18, [1, 0] : vector<32x256xf32> -> vector<256x32xf32>
      %20 = arith.truncf %19 : vector<256x32xf32> to vector<256x32xbf16>
      %c0_15 = arith.constant 0 : index
      %c0_16 = arith.constant 0 : index
      %21 = vector.load %arg8[%c0_15, %c0_16] : memref<256x32xbf16, #tpu.memory_space<vmem>>, vector<256x32xbf16>
      tpu.vector_store %arg8[%c0_15, %c0_16], %20 {strides = array<i32>} : memref<256x32xbf16, #tpu.memory_space<vmem>>, vector<256x32xbf16>,
      %cst_17 = arith.constant 0xFF800000 : f32
      %22 = vector.broadcast %cst_17 : f32 to vector<256x128xf32>
      %c0_18 = arith.constant 0 : index
      %c0_19 = arith.constant 0 : index
      %23 = vector.load %arg9[%c0_18, %c0_19] : memref<256x128xf32, #tpu.memory_space<vmem>>, vector<256x128xf32>
      tpu.vector_store %arg9[%c0_18, %c0_19], %22 {strides = array<i32>} : memref<256x128xf32, #tpu.memory_space<vmem>>, vector<256x128xf32>,
    } else {
    }
    %c0 = arith.constant 0 : index
    %c0_1 = arith.constant 0 : index
    %3 = vector.load %arg8[%c0, %c0_1] : memref<256x32xbf16, #tpu.memory_space<vmem>>, vector<256x32xbf16>
    %c0_2 = arith.constant 0 : index
    %c0_3 = arith.constant 0 : index
    %c0_4 = arith.constant 0 : index
    %4 = vector.load %arg4[%c0_2, %c0_3, %c0_4] : memref<1x32x256xbf16, #tpu.memory_space<vmem>>, vector<1x32x256xbf16>
    %5 = vector.shape_cast %4 : vector<1x32x256xbf16> to vector<32x256xbf16>
    %6 = vector.extract_strided_slice %5 {offsets = [0, 0], sizes = [32, 128], strides = [1, 1]} : vector<32x256xbf16> to vector<32x128xbf16>
    %cst = arith.constant dense<0.000000e+00> : vector<256x128xf32>
    %7 = tpu.matmul %3, %6, %cst {dimension_numbers = #tpu.dot_dimension_numbers<[1], [0], [0], [1], [0, 0, 1, 1], [], []>} : vector<256x32xbf16>, vector<32x128xbf16>, vector<256x128xf32> -> vector<256x128xf32>
    %8 = vector.extract_strided_slice %5 {offsets = [0, 128], sizes = [32, 128], strides = [1, 1]} : vector<32x256xbf16> to vector<32x128xbf16>
    %cst_5 = arith.constant dense<0.000000e+00> : vector<256x128xf32>
    %9 = tpu.matmul %3, %8, %cst_5 {dimension_numbers = #tpu.dot_dimension_numbers<[1], [0], [0], [1], [0, 0, 1, 1], [], []>} : vector<256x32xbf16>, vector<32x128xbf16>, vector<256x128xf32> -> vector<256x128xf32>
    %10 = arith.maximumf %7, %9 : vector<256x128xf32>
    %c0_6 = arith.constant 0 : index
    %c0_7 = arith.constant 0 : index
    %11 = vector.load %arg9[%c0_6, %c0_7] : memref<256x128xf32, #tpu.memory_space<vmem>>, vector<256x128xf32>
    %12 = arith.maximumf %11, %10 : vector<256x128xf32>
    %c0_8 = arith.constant 0 : index
    %c0_9 = arith.constant 0 : index
    %13 = vector.load %arg9[%c0_8, %c0_9] : memref<256x128xf32, #tpu.memory_space<vmem>>, vector<256x128xf32>
    tpu.vector_store %arg9[%c0_8, %c0_9], %12 {strides = array<i32>} : memref<256x128xf32, #tpu.memory_space<vmem>>, vector<256x128xf32>,
    %c0_i32_10 = arith.constant 0 : i32
    %14 = arith.cmpi eq, %arg2, %c0_i32_10 : i32
    %15 = arith.extui %14 : i1 to i32
    %c0_i32_11 = arith.constant 0 : i32
    %16 = arith.cmpi ne, %15, %c0_i32_11 : i32
    scf.if %16 {
      %c0_12 = arith.constant 0 : index
      %c0_13 = arith.constant 0 : index
      %17 = vector.load %arg9[%c0_12, %c0_13] : memref<256x128xf32, #tpu.memory_space<vmem>>, vector<256x128xf32>
      %cst_14 = arith.constant dense<0xFF800000> : vector<256xf32>
      %18 = vector.multi_reduction <maximumf>, %17, %cst_14 [1] : vector<256x128xf32> to vector<256xf32>
      %19 = vector.shape_cast %18 : vector<256xf32> to vector<1x1x256xf32>
      %c0_15 = arith.constant 0 : index
      %c0_16 = arith.constant 0 : index
      %c0_17 = arith.constant 0 : index
      %20 = vector.load %arg6[%c0_15, %c0_16, %c0_17] : memref<1x1x256xf32, #tpu.memory_space<vmem>>, vector<1x1x256xf32>
      tpu.vector_store %arg6[%c0_15, %c0_16, %c0_17], %19 {strides = array<i32>} : memref<1x1x256xf32, #tpu.memory_space<vmem>>, vector<1x1x256xf32>,
      %c0_18 = arith.constant 0 : index
      %c0_19 = arith.constant 0 : index
      %c0_20 = arith.constant 0 : index
      %21 = vector.load %arg5[%c0_18, %c0_19, %c0_20] : memref<1x1x32xf32, #tpu.memory_space<vmem>>, vector<1x1x32xf32>
      %22 = vector.shape_cast %21 : vector<1x1x32xf32> to vector<1x32xf32>
      %c0_21 = arith.constant 0 : index
      %c0_22 = arith.constant 0 : index
      %c0_23 = arith.constant 0 : index
      %23 = vector.load %arg3[%c0_21, %c0_22, %c0_23] : memref<1x32x256xf32, #tpu.memory_space<vmem>>, vector<1x32x256xf32>
      %24 = vector.shape_cast %23 : vector<1x32x256xf32> to vector<32x256xf32>
      %cst_24 = arith.constant dense<0.000000e+00> : vector<1x256xf32>
      %25 = tpu.matmul %22, %24, %cst_24 {dimension_numbers = #tpu.dot_dimension_numbers<[1], [0], [0], [1], [0, 0, 1, 1], [], []>} : vector<1x32xf32>, vector<32x256xf32>, vector<1x256xf32> -> vector<1x256xf32>
      %cst_25 = arith.constant 3.906250e-03 : f32
      %26 = vector.broadcast %cst_25 : f32 to vector<1x256xf32>
      %27 = arith.mulf %25, %26 : vector<1x256xf32>
      %28 = vector.shape_cast %27 : vector<1x256xf32> to vector<1x1x256xf32>
      %c0_26 = arith.constant 0 : index
      %c0_27 = arith.constant 0 : index
      %c0_28 = arith.constant 0 : index
      %29 = vector.load %arg7[%c0_26, %c0_27, %c0_28] : memref<1x1x256xf32, #tpu.memory_space<vmem>>, vector<1x1x256xf32>
      tpu.vector_store %arg7[%c0_26, %c0_27, %c0_28], %28 {strides = array<i32>} : memref<1x1x256xf32, #tpu.memory_space<vmem>>, vector<1x1x256xf32>,
    } else {
    }
    return
  }
  func.func @transform_0(%arg0: i32, %arg1: i32, %arg2: i32) -> (i32, i32, i32) {
    %c0_i32 = arith.constant 0 : i32
    %c0_i32_0 = arith.constant 0 : i32
    return %arg0, %c0_i32, %arg1 : i32, i32, i32
  }
  func.func @transform_1(%arg0: i32, %arg1: i32, %arg2: i32) -> (i32, i32, i32) {
    %c0_i32 = arith.constant 0 : i32
    %c0_i32_0 = arith.constant 0 : i32
    return %arg0, %c0_i32, %arg2 : i32, i32, i32
  }
  func.func @transform_2(%arg0: i32, %arg1: i32, %arg2: i32) -> (i32, i32, i32) {
    %c0_i32 = arith.constant 0 : i32
    %c0_i32_0 = arith.constant 0 : i32
    %c0_i32_1 = arith.constant 0 : i32
    return %arg0, %c0_i32, %c0_i32_0 : i32, i32, i32
  }
  func.func @transform_3(%arg0: i32, %arg1: i32, %arg2: i32) -> (i32, i32, i32) {
    %c0_i32 = arith.constant 0 : i32
    %c0_i32_0 = arith.constant 0 : i32
    return %arg0, %c0_i32, %arg1 : i32, i32, i32
  }
  func.func @transform_4(%arg0: i32, %arg1: i32, %arg2: i32) -> (i32, i32, i32) {
    %c0_i32 = arith.constant 0 : i32
    %c0_i32_0 = arith.constant 0 : i32
    return %arg0, %c0_i32, %arg1 : i32, i32, i32
  }
}

</mosaic_0001>

<bundles_post_ra>
// kernel: tpu_custom_call.1
= control target key start
LH: loop header
LB: loop body
LE: loop exit
PB: predicated region body
PF: predicated region fallthrough
CT: control target
= control target key end

     0   :  { %s6049_s0 = inlined_call_operand.hbm [shape: f32[2,32,256], index: 0, kind: input, shape index: {}]   ;;  %s6050_s1 = inlined_call_operand.hbm [shape: bf16[2,32,256], index: 1, kind: input, shape index: {}]   ;;  %s6051_s2 = inlined_call_operand.vmem [shape: f32[2,1,32], index: 2, kind: input, shape index: {}]   ;;  %s6052_s3 = inlined_call_operand.hbm [shape: f32[2,1,256], index: 3, kind: output, shape index: {0}]   ;;  %s6053_s4 = inlined_call_operand.hbm [shape: f32[2,1,256], index: 4, kind: output, shape index: {1}]  }
   0x1   :  { %6055 = sst [smem:[#allocation17_spill]] %s6049_s0 }
   0x2   :  { %10 = vsyncpa [#allocation5], 0 }
   0x3   :  { %12 = vsyncpa [#allocation5 + $0x1], 0 }
   0x4   :  { %13 = vsyncpa [#allocation8], 0 }
   0x5   :  { %15 = vsyncpa [#allocation8 + $0x1], 0 }
   0x6   :  { %16 = vsyncpa [#allocation6], 0 }
   0x7   :  { %18 = vsyncpa [#allocation6 + $0x1], 0 }
   0x8   :  { %19 = vsyncpa [#allocation11], 0 }
   0x9   :  { %21 = vsyncpa [#allocation11 + $0x1], 0  ;;  %s5113_s15 = smov 0   ;;  %s5115_s16 = smov 0  }
   0xa   :  { %s5117_s17 = smov 0   ;;  %s5119_s18 = smov 0  }
   0xb   :  { %s5121_s19 = smov 0   ;;  %s5123_s20 = smov 0  }
   0xc LB: > { %s4550_s21 = sadd.s32 4294967295, %s5075_s20   ;;  %s4551_s22 = sadd.s32 4294967294, %s5075_s20   ;;  %s5075_s20 = sphi %s5123_s20, %s27_s20   ;;  %s5071_s19 = sphi %s5121_s19, %s6072_s19   ;;  %s5067_s18 = sphi %s5119_s18, %s6071_s18   ;;  %s5063_s17 = sphi %s5117_s17, %s6070_s17   ;;  %s5059_s16 = sphi %s5115_s16, %s6069_s16   ;;  %s5055_s15 = sphi %s5113_s15, %s6068_s15  }
   0xd   : > { %s46_s23 = sadd.s32 1, %s5071_s19  ;;  %s55_s24 = sadd.s32 1, %s5063_s17 }
   0xe   : > { %p48_p0 = scmp.ge.s32.totalorder %s46_s23, 2  ;;  %p62_p1 = scmp.ne.s32.totalorder %s5063_s17, %s5059_s16 }
   0xf   : > { %p63_p2 = scmp.eq.s32.totalorder %s5075_s20, 0  ;;  %p68_p3 = scmp.ne.s32.totalorder %s5059_s16, %s5055_s15 }
  0x10   : > { %s6074_s23 = smov (%p48_p0, %s46_s23), 0  ;;  %p69_p5 = scmp.eq.s32.totalorder %s4550_s21, 0 }
  0x11   : > { %6056 = sst [smem:[#allocation16_spill]] %s6074_s23  ;;  %p5154_p4 = por %p63_p2, %p62_p1 }
  0x12   : > { %s50_s26 = ssub.s32 %s5071_s19, %s6074_s23  ;;  %p148_p6 = scmp.eq.s32.totalorder %s4550_s21, 1 }
  0x13   : > { %p53_p7 = scmp.eq.s32.totalorder %s50_s26, 0  ;;  %p5160_p8 = por %p69_p5, %p68_p3 }
  0x14   : > { %p5164_p9 = por %p148_p6, %p62_p1  ;;  %p154_p10 = scmp.eq.s32.totalorder %s4551_s22, 1 }
  0x15   : > { %s5169_s29 = scalar_select %p53_p7, %s5063_s17, %s55_s24  }
  0x16   : > { %p5171_p11 = por %p154_p10, %p68_p3  ;;  %p4824_p13 = scmp.lt.s32.totalorder %s5075_s20, 2 }
  0x17   : > { %s5178_s5 = sand.u32 1, %s5063_s17   ;;  %s4658_s7 = sshll.u32 %s5071_s19, 10 }
  0x18   : > { %s4554_s6 = sshll.u32 %s5178_s5, 6  ;;  %s6061_s0 = sld [smem:[#allocation17_spill]] }
  0x19   : > { %s206_s11 = scalar_lea.vmem [#allocation4], %s4554_s6  ;;  %p5187_p0 = pnand %p4824_p13, %p5154_p4 }
  0x1a   : > { %s215_s12 = sshll.u32 %s206_s11, 4  ;;  %p4560_p1 = scmp.ge.s32.totalorder %s5075_s20, 1  ;;  %s216_s12 = int_to_ptr.vmem [resolvable:$true] %s215_s12 }
  0x1b   : > { %s203_s14 = scalar_lea.sflag [#allocation5], %s5178_s5  ;;  %p4907_p2 = pneg %p5187_p0 }
  0x1c   : > { %s4918_s21 = scalar_lea.vmem %s216_s12, 1024  ;;  %s5077_s22 = smov [#allocation4]  }
  0x1d   : > { %p4919_p3 = scmp.ne.s32.totalorder %s216_s12, %s4918_s21  ;;  %s4923_s24 = sshll.u32 %s5077_s22, 4  ;;  %s4924_s24 = int_to_ptr.vmem [resolvable:$false] %s4923_s24 }
  0x1e   : > { %s214_s10 = scalar_lea.hbm %s6061_s0, %s4658_s7  ;;  %s4925_s25 = scalar_lea.vmem %s4924_s24, 2048 }
  0x1f   : > { %p4921_p5 = pnand %p4919_p3, %p4907_p2  ;;  %p4926_p4 = scmp.lt.s32.totalorder %s216_s12, %s4924_s24 }
  0x20   : > { %p4927_p7 = scmp.lt.s32.totalorder %s4925_s25, %s4918_s21 }
  0x21   : > { %p4922_p6 = pneg %p4921_p5 }
  0x22   : > { %p4928_p10 = por %p4927_p7, %p4926_p4 }
  0x24   : > { %p4929_p13 = pnand %p4928_p10, %p4922_p6 }
  0x26   : > { %4932 = shalt.err (!%p4929_p13)
}
  0x27   : > { %s5078_s26 = smov 256   ;;  %s5079_s6 = smov 16  }
  0x28   : > { %4813 = dma.hbm_to_vmem [thread:$0]  (!%p5187_p0), %s214_s10, 1024, %s216_s12, %s203_s14, %s5078_s26, %s5078_s26, %s5079_s6  }
  0x29   : > { %p252_p3 = scmp.lt.s32.totalorder %s5075_s20, 3  ;;  %s4557_s7 = sshll.u32 %s5178_s5, 5 }
  0x2a   : > { %s4659_s8 = sshll.u32 %s5071_s19, 9  ;;  %s229_s24 = scalar_lea.vmem [#allocation7], %s4557_s7 }
  0x2b   : > { %p5205_p5 = pnand %p4560_p1, %p252_p3  ;;  %s237_s22 = scalar_lea.hbm %s6050_s1, %s4659_s8 }
  0x2c   : > { %s238_s25 = sshll.u32 %s229_s24, 4  ;;  %s226_s0 = scalar_lea.sflag [#allocation8], %s5178_s5  ;;  %s239_s25 = int_to_ptr.vmem [resolvable:$true] %s238_s25 }
  0x2d   : > { %s4946_s23 = scalar_lea.vmem %s239_s25, 512  ;;  %s5080_s10 = smov [#allocation7]  }
  0x2e   : > { %p4947_p6 = scmp.ne.s32.totalorder %s239_s25, %s4946_s23  ;;  %s4951_s12 = sshll.u32 %s5080_s10, 4  ;;  %s4952_s12 = int_to_ptr.vmem [resolvable:$false] %s4951_s12 }
  0x2f   : > { %s4953_s14 = scalar_lea.vmem %s4952_s12, 1024  ;;  %p4954_p1 = scmp.lt.s32.totalorder %s239_s25, %s4952_s12 }
  0x30   : > { %p4949_p4 = pnand %p4947_p6, %p4907_p2  ;;  %p4955_p10 = scmp.lt.s32.totalorder %s4953_s14, %s4946_s23 }
  0x32   : > { %p4950_p7 = pneg %p4949_p4  ;;  %p4956_p13 = por %p4955_p10, %p4954_p1 }
  0x34   : > { %p4957_p3 = pnand %p4956_p13, %p4950_p7 }
  0x36   : > { %4960 = shalt.err (!%p4957_p3)
}
  0x37   : > { %s5081_s26 = smov 128   ;;  %s5082_s6 = smov 8  }
  0x38   : > { %4816 = dma.hbm_to_vmem [thread:$0]  (!%p5187_p0), %s237_s22, 512, %s239_s25, %s226_s0, %s5081_s26, %s5081_s26, %s5082_s6  }
  0x39   : > { %256 = sbr.rel (%p5205_p5) target bundleno = 868 (0x364), region = 32  ;;  %s5221_s5 = sand.u32 (!%p5205_p5), 1, %s5059_s16  }
  0x3a   : > { %s4561_s7 = sshll.u32 (!%p5205_p5), %s5221_s5, 6  ;;  %s259_s8 = scalar_lea.sflag (!%p5205_p5), [#allocation5], %s5221_s5 }
  0x3b   : > { %s262_s23 = scalar_lea.vmem (!%p5205_p5), [#allocation4], %s4561_s7 }
  0x3e   : > { %5038 = dma.done.wait (%p5160_p8), %s259_s8, 1024  }
  0x3f   : > { %5040 = vsyncadd (%p5160_p8), %s259_s8, 4294966272  ;;  %s4562_s0 = sshll.u32 %s5221_s5, 5  ;;  %s268_s13 = scalar_lea.sflag [#allocation8], %s5221_s5 }
  0x40   : > { %s271_s9 = scalar_lea.vmem [#allocation7], %s4562_s0 }
  0x41   : > { %5042 = dma.done.wait (%p5160_p8), %s268_s13, 512  }
  0x42   : > { %5044 = vsyncadd (%p5160_p8), %s268_s13, 4294966784  ;;  %v5235_v0 = vld [vmem:[%s262_s23] sm:$0xff]  ;;  %v5238_v1 = vld [vmem:[%s262_s23 + $0x8] sm:$0xff]  ;;  %vm521_vm0 = vcmask 257024   ;;  %vm714_vm1 = vcmask 261120   ;;  %p311_p8 = scmp.lt.s32.totalorder %s5067_s18, 1 }
  0x43   : > { %329 = vxpose.xlu0.b32.start [1/4] (short) %v5235_v0, 128  ;;  %v5240_v2 = vld [vmem:[%s262_s23 + $0x10] sm:$0xff]  ;;  %361 = vxpose.xlu1.b32.start [1/4] (short) %v5238_v1, 128  ;;  %v5243_v3 = vld [vmem:[%s262_s23 + $0x18] sm:$0xff]  ;;  %v5246_v4 = vld [vmem:[%s262_s23 + $0x20] sm:$0xff]  ;;  %s4563_s24 = sshll.u32 %s5221_s5, 1  ;;  %s4692_s25 = sshll.u32 %s5067_s18, 5 }
  0x44   : > { %v5249_v5 = vld [vmem:[%s262_s23 + $0x28] sm:$0xff]  ;;  %v5252_v6 = vld [vmem:[%s262_s23 + $0x30] sm:$0xff]  ;;  %v328_v7 = vld [vmem:[%s262_s23 + $0x38] sm:$0xff]  ;;  %s312_s27 = scalar_select %p311_p8, %s5067_s18, 1 }
  0x45   : > { %v4883_v8 = vld [vmem:[%s271_s9 + $0x10] ss:$8 sps:$4 sm:$0xff]   ;;  %v4886_v9 = vld [vmem:[%s271_s9 + $0x14] ss:$8 sps:$4 sm:$0xff]   ;;  %v4887_v10 = vld [vmem:[%s271_s9] ss:$8 sps:$4 sm:$0xff]   ;;  %s5889_s6 = scalar_lea.hbm %s6053_s4, %s4692_s25 }
  0x46   : > { %4730 = vmatprep.subr.bf16.mxu0 %v4883_v8  ;;  %4766 = vmatprep.subr.bf16.mxu1 %v4886_v9  ;;  %v4889_v11 = vld [vmem:[%s271_s9 + $0x4] ss:$8 sps:$4 sm:$0xff]   ;;  %s313_s22 = scalar_lea.vmem %s6051_s2, %s312_s27  ;;  %s308_s10 = scalar_lea.vmem [#allocation10], %s4563_s24 }
  0x47   : > { %330 = vxpose.xlu0.b32.cont [2/4] (short) %v5240_v2, 128  ;;  %362 = vxpose.xlu1.b32.cont [2/4] (short) %v5243_v3, 128  ;;  %s4393_s12 = sshll.u32 %s308_s10, 4  ;;  %s4361_s7 = scalar_lea.sflag [#allocation11], %s5221_s5  ;;  %s4394_s12 = int_to_ptr.vmem [resolvable:$true] %s4393_s12 }
  0x48   : > { %4731 = vmatpush3.bf16.msra.mxu0 %v4883_v8  ;;  %4767 = vmatpush3.bf16.msra.mxu1 %v4886_v9  ;;  %s4961_s8 = scalar_lea.vmem %s4394_s12, 32  ;;  %s5086_s23 = smov [#allocation10]  }
  0x49   : > { %4732 = vmatprep.subr.bf16.mxu0 %v4887_v10  ;;  %4768 = vmatprep.subr.bf16.mxu1 %v4889_v11  ;;  %p4962_p0 = scmp.ne.s32.totalorder %s4394_s12, %s4961_s8  ;;  %s4965_s0 = sshll.u32 %s5086_s23, 4  ;;  %s4966_s0 = int_to_ptr.vmem [resolvable:$false] %s4965_s0 }
  0x4a   : > { %s4967_s13 = scalar_lea.vmem %s4966_s0, 64  ;;  %p4968_p6 = scmp.lt.s32.totalorder %s4394_s12, %s4966_s0 }
  0x4b   : > { %331 = vxpose.xlu0.b32.cont [3/4] (short) %v5246_v4, 128  ;;  %363 = vxpose.xlu1.b32.cont [3/4] (short) %v5249_v5, 128  ;;  %p4963_p2 = pnand %p4962_p0, %p5164_p9  ;;  %p4969_p4 = scmp.lt.s32.totalorder %s4967_s13, %s4961_s8 }
  0x4c   : > { %4733 = vmatpush3.bf16.msra.mxu0 %v4887_v10  ;;  %4769 = vmatpush3.bf16.msra.mxu1 %v4889_v11 }
  0x4d   : > { %4287 = vmatprep.subr.mxu0 %v328_v7  ;;  %p4964_p5 = pneg %p4963_p2  ;;  %p4970_p7 = por %p4969_p4, %p4968_p6 }
  0x4f   : > { %332 = vxpose.xlu0.b32.end [4/4] (short) %v5252_v6, 128  ;;  %364 = vxpose.xlu1.b32.end [4/4] (short) %v328_v7, 128  ;;  %p4971_p1 = pnand %p4970_p7, %p4964_p5 }
  0xbf   : > { %v345_v12 = vpop.trf.xlu0  ;;  %v377_v14 = vpop.trf.xlu1 }
  0xc0   : > { %v4660_v13 = vpack.c.bf16 %v345_v12, %v345_v12  ;;  %v4676_v15 = vpack.c.bf16 %v377_v14, %v377_v14 }
  0xc2   : > { %522 = vst.msk [vmem:[#allocation2] sm:$0xf] %vm521_vm0, %v4660_v13  ;;  %538 = vst.msk [vmem:[#allocation2 + $0x40] sm:$0xf] %vm521_vm0, %v4676_v15 }
  0xc3   : > { %v346_v16 = vpop.trf.xlu0  ;;  %v378_v18 = vpop.trf.xlu1 }
  0xc4   : > { %v4661_v17 = vpack.c.bf16 %v346_v16, %v346_v16  ;;  %v4677_v19 = vpack.c.bf16 %v378_v18, %v378_v18 }
  0xc6   : > { %523 = vst.msk [vmem:[#allocation2 + $0x4] sm:$0xf] %vm521_vm0, %v4661_v17  ;;  %539 = vst.msk [vmem:[#allocation2 + $0x44] sm:$0xf] %vm521_vm0, %v4677_v19 }
  0xc7   : > { %v347_v20 = vpop.trf.xlu0  ;;  %v379_v22 = vpop.trf.xlu1 }
  0xc8   : > { %v4662_v21 = vpack.c.bf16 %v347_v20, %v347_v20  ;;  %v4678_v23 = vpack.c.bf16 %v379_v22, %v379_v22 }
  0xca   : > { %524 = vst.msk [vmem:[#allocation2 + $0x8] sm:$0xf] %vm521_vm0, %v4662_v21  ;;  %540 = vst.msk [vmem:[#allocation2 + $0x48] sm:$0xf] %vm521_vm0, %v4678_v23 }
  0xcb   : > { %v348_v24 = vpop.trf.xlu0  ;;  %v380_v26 = vpop.trf.xlu1 }
  0xcc   : > { %v4663_v25 = vpack.c.bf16 %v348_v24, %v348_v24  ;;  %v4679_v28 = vpack.c.bf16 %v380_v26, %v380_v26 }
  0xcd   : > { %v4885_v27 = vld [vmem:[#allocation2] sm:$0xff]  }
  0xce   : > { %525 = vst.msk [vmem:[#allocation2 + $0xc] sm:$0xf] %vm521_vm0, %v4663_v25  ;;  %4734 = vmatprep.mubr.msk.bf16.mxu0 %vm714_vm1, %v4885_v27  ;;  %4770 = vmatprep.mubr.msk.bf16.mxu1 %vm714_vm1, %v4885_v27  ;;  %541 = vst.msk [vmem:[#allocation2 + $0x4c] sm:$0xf] %vm521_vm0, %v4679_v28  ;;  %v4897_v20 = vld [vmem:[#allocation2 + $0x40] sm:$0xff]  }
  0xcf   : > { %v349_v29 = vpop.trf.xlu0  ;;  %v381_v31 = vpop.trf.xlu1 }
  0xd0   : > { %v4664_v30 = vpack.c.bf16 %v349_v29, %v349_v29  ;;  %v4680_v32 = vpack.c.bf16 %v381_v31, %v381_v31 }
  0xd2   : > { %526 = vst.msk [vmem:[#allocation2 + $0x10] sm:$0xf] %vm521_vm0, %v4664_v30  ;;  %542 = vst.msk [vmem:[#allocation2 + $0x50] sm:$0xf] %vm521_vm0, %v4680_v32 }
  0xd3   : > { %v350_v33 = vpop.trf.xlu0  ;;  %v382_v35 = vpop.trf.xlu1 }
  0xd4   : > { %v4665_v34 = vpack.c.bf16 %v350_v33, %v350_v33  ;;  %v4681_v37 = vpack.c.bf16 %v382_v35, %v382_v35 }
  0xd5   : > { %v4890_v36 = vld [vmem:[#allocation2 + $0x8] sm:$0xff]  }
  0xd6   : > { %527 = vst.msk [vmem:[#allocation2 + $0x14] sm:$0xf] %vm521_vm0, %v4665_v34  ;;  %4735 = vmatmul.mubr.msk.bf16.vlgmr.msra.gmra.mxu0 %vm714_vm1, %v4890_v36  ;;  %4771 = vmatmul.mubr.msk.bf16.vlgmr.msra.gmra.mxu1 %vm714_vm1, %v4890_v36  ;;  %543 = vst.msk [vmem:[#allocation2 + $0x54] sm:$0xf] %vm521_vm0, %v4681_v37  ;;  %v4898_v21 = vld [vmem:[#allocation2 + $0x48] sm:$0xff]  }
  0xd7   : > { %v351_v38 = vpop.trf.xlu0  ;;  %v383_v40 = vpop.trf.xlu1  ;;  %4288 = vmatpush1.msra.mxu0 %v5252_v6 }
  0xd8   : > { %v4666_v39 = vpack.c.bf16 %v351_v38, %v351_v38  ;;  %v4682_v41 = vpack.c.bf16 %v383_v40, %v383_v40  ;;  %4289 = vmatprep.subr.mxu0 %v5249_v5 }
  0xd9   : > { %4290 = vmatpush1.msra.mxu0 %v5246_v4 }
  0xda   : > { %528 = vst.msk [vmem:[#allocation2 + $0x18] sm:$0xf] %vm521_vm0, %v4666_v39  ;;  %544 = vst.msk [vmem:[#allocation2 + $0x58] sm:$0xf] %vm521_vm0, %v4682_v41  ;;  %4291 = vmatprep.subr.mxu0 %v5243_v3 }
  0xdb   : > { %v352_v42 = vpop.trf.xlu0  ;;  %v384_v44 = vpop.trf.xlu1  ;;  %4292 = vmatpush1.msra.mxu0 %v5240_v2 }
  0xdc   : > { %v4667_v43 = vpack.c.bf16 %v352_v42, %v352_v42  ;;  %v4683_v46 = vpack.c.bf16 %v384_v44, %v384_v44  ;;  %4293 = vmatprep.subr.mxu0 %v5238_v1 }
  0xdd   : > { %v4891_v45 = vld [vmem:[#allocation2 + $0x10] sm:$0xff]   ;;  %4294 = vmatpush1.msra.mxu0 %v5235_v0 }
  0xde   : > { %529 = vst.msk [vmem:[#allocation2 + $0x1c] sm:$0xf] %vm521_vm0, %v4667_v43  ;;  %4738 = vmatprep.mubr.msk.bf16.mxu0 %vm714_vm1, %v4891_v45  ;;  %4774 = vmatprep.mubr.msk.bf16.mxu1 %vm714_vm1, %v4891_v45  ;;  %545 = vst.msk [vmem:[#allocation2 + $0x5c] sm:$0xf] %vm521_vm0, %v4683_v46  ;;  %v4899_v22 = vld [vmem:[#allocation2 + $0x50] sm:$0xff]  }
  0xdf   : > { %v353_v47 = vpop.trf.xlu0  ;;  %v385_v49 = vpop.trf.xlu1 }
  0xe0   : > { %v4668_v48 = vpack.c.bf16 %v353_v47, %v353_v47  ;;  %v4684_v50 = vpack.c.bf16 %v385_v49, %v385_v49  ;;  %v5083_v49 = vmov 0  }
  0xe1   : > { %4881 = vset.pattern.permute.xlu1 %v5083_v49  ;;  %4882 = vset.pattern.permute.xlu0 %v5083_v49 }
  0xe2   : > { %530 = vst.msk [vmem:[#allocation2 + $0x20] sm:$0xf] %vm521_vm0, %v4668_v48  ;;  %546 = vst.msk [vmem:[#allocation2 + $0x60] sm:$0xf] %vm521_vm0, %v4684_v50 }
  0xe3   : > { %v354_v51 = vpop.trf.xlu0  ;;  %v386_v53 = vpop.trf.xlu1 }
  0xe4   : > { %v4669_v52 = vpack.c.bf16 %v354_v51, %v354_v51  ;;  %v4685_v55 = vpack.c.bf16 %v386_v53, %v386_v53 }
  0xe5   : > { %v4892_v54 = vld [vmem:[#allocation2 + $0x18] sm:$0xff]  }
  0xe6   : > { %531 = vst.msk [vmem:[#allocation2 + $0x24] sm:$0xf] %vm521_vm0, %v4669_v52  ;;  %4739 = vmatmul.mubr.msk.bf16.gmra.mxu0 %vm714_vm1, %v4892_v54  ;;  %4775 = vmatmul.mubr.msk.bf16.gmra.mxu1 %vm714_vm1, %v4892_v54  ;;  %547 = vst.msk [vmem:[#allocation2 + $0x64] sm:$0xf] %vm521_vm0, %v4685_v55  ;;  %v4900_v23 = vld [vmem:[#allocation2 + $0x58] sm:$0xff]  }
  0xe7   : > { %v355_v56 = vpop.trf.xlu0  ;;  %v387_v58 = vpop.trf.xlu1 }
  0xe8   : > { %v4670_v57 = vpack.c.bf16 %v355_v56, %v355_v56  ;;  %v4686_v59 = vpack.c.bf16 %v387_v58, %v387_v58 }
  0xea   : > { %532 = vst.msk [vmem:[#allocation2 + $0x28] sm:$0xf] %vm521_vm0, %v4670_v57  ;;  %548 = vst.msk [vmem:[#allocation2 + $0x68] sm:$0xf] %vm521_vm0, %v4686_v59 }
  0xeb   : > { %v356_v60 = vpop.trf.xlu0  ;;  %v388_v62 = vpop.trf.xlu1 }
  0xec   : > { %v4671_v61 = vpack.c.bf16 %v356_v60, %v356_v60  ;;  %v4687_v0 = vpack.c.bf16 %v388_v62, %v388_v62 }
  0xed   : > { %v4893_v63 = vld [vmem:[#allocation2 + $0x20] sm:$0xff]  }
  0xee   : > { %533 = vst.msk [vmem:[#allocation2 + $0x2c] sm:$0xf] %vm521_vm0, %v4671_v61  ;;  %4742 = vmatprep.mubr.msk.bf16.mxu0 %vm714_vm1, %v4893_v63  ;;  %4778 = vmatprep.mubr.msk.bf16.mxu1 %vm714_vm1, %v4893_v63  ;;  %549 = vst.msk [vmem:[#allocation2 + $0x6c] sm:$0xf] %vm521_vm0, %v4687_v0  ;;  %v4901_v24 = vld [vmem:[#allocation2 + $0x60] sm:$0xff]  }
  0xef   : > { %v357_v1 = vpop.trf.xlu0  ;;  %v389_v3 = vpop.trf.xlu1 }
  0xf0   : > { %v4672_v2 = vpack.c.bf16 %v357_v1, %v357_v1  ;;  %v4688_v4 = vpack.c.bf16 %v389_v3, %v389_v3 }
  0xf2   : > { %534 = vst.msk [vmem:[#allocation2 + $0x30] sm:$0xf] %vm521_vm0, %v4672_v2  ;;  %550 = vst.msk [vmem:[#allocation2 + $0x70] sm:$0xf] %vm521_vm0, %v4688_v4 }
  0xf3   : > { %v358_v5 = vpop.trf.xlu0  ;;  %v390_v7 = vpop.trf.xlu1 }
  0xf4   : > { %v4673_v6 = vpack.c.bf16 %v358_v5, %v358_v5  ;;  %v4689_v9 = vpack.c.bf16 %v390_v7, %v390_v7 }
  0xf5   : > { %v4894_v8 = vld [vmem:[#allocation2 + $0x28] sm:$0xff]  }
  0xf6   : > { %535 = vst.msk [vmem:[#allocation2 + $0x34] sm:$0xf] %vm521_vm0, %v4673_v6  ;;  %4743 = vmatmul.mubr.msk.bf16.gmra.mxu0 %vm714_vm1, %v4894_v8  ;;  %4779 = vmatmul.mubr.msk.bf16.gmra.mxu1 %vm714_vm1, %v4894_v8  ;;  %551 = vst.msk [vmem:[#allocation2 + $0x74] sm:$0xf] %vm521_vm0, %v4689_v9  ;;  %v4902_v25 = vld [vmem:[#allocation2 + $0x68] sm:$0xff]  }
  0xf7   : > { %v359_v10 = vpop.trf.xlu0  ;;  %v391_v12 = vpop.trf.xlu1 }
  0xf8   : > { %v4674_v11 = vpack.c.bf16 %v359_v10, %v359_v10  ;;  %v4690_v13 = vpack.c.bf16 %v391_v12, %v391_v12 }
  0xfa   : > { %536 = vst.msk [vmem:[#allocation2 + $0x38] sm:$0xf] %vm521_vm0, %v4674_v11  ;;  %552 = vst.msk [vmem:[#allocation2 + $0x78] sm:$0xf] %vm521_vm0, %v4690_v13 }
  0xfb   : > { %v360_v14 = vpop.trf.xlu0  ;;  %v392_v16 = vpop.trf.xlu1 }
  0xfc   : > { %v4675_v15 = vpack.c.bf16 %v360_v14, %v360_v14  ;;  %v4691_v18 = vpack.c.bf16 %v392_v16, %v392_v16 }
  0xfd   : > { %v4895_v17 = vld [vmem:[#allocation2 + $0x30] sm:$0xff]  }
  0xfe   : > { %537 = vst.msk [vmem:[#allocation2 + $0x3c] sm:$0xf] %vm521_vm0, %v4675_v15  ;;  %4746 = vmatprep.mubr.msk.bf16.mxu0 %vm714_vm1, %v4895_v17  ;;  %4782 = vmatprep.mubr.msk.bf16.mxu1 %vm714_vm1, %v4895_v17  ;;  %553 = vst.msk [vmem:[#allocation2 + $0x7c] sm:$0xf] %vm521_vm0, %v4691_v18  ;;  %v4903_v26 = vld [vmem:[#allocation2 + $0x70] sm:$0xff]   ;;  %v5084_v18 = vmov 0.0  }
 0x105   : > { %v4896_v19 = vld [vmem:[#allocation2 + $0x38] sm:$0xff]  }
 0x106   : > { %4747 = vmatmul.mubr.msk.bf16.gmra.mxu0 %vm714_vm1, %v4896_v19  ;;  %4783 = vmatmul.mubr.msk.bf16.gmra.mxu1 %vm714_vm1, %v4896_v19  ;;  %v4904_v27 = vld [vmem:[#allocation2 + $0x78] sm:$0xff]  }
 0x107   : > { %4750 = vmatprep.mubr.msk.bf16.mxu0 %vm714_vm1, %v4897_v20  ;;  %4786 = vmatprep.mubr.msk.bf16.mxu1 %vm714_vm1, %v4897_v20 }
 0x10e   : > { %4751 = vmatmul.mubr.msk.bf16.gmra.mxu0 %vm714_vm1, %v4898_v21  ;;  %4787 = vmatmul.mubr.msk.bf16.gmra.mxu1 %vm714_vm1, %v4898_v21 }
 0x10f   : > { %4754 = vmatprep.mubr.msk.bf16.mxu0 %vm714_vm1, %v4899_v22  ;;  %4790 = vmatprep.mubr.msk.bf16.mxu1 %vm714_vm1, %v4899_v22 }
 0x116   : > { %4755 = vmatmul.mubr.msk.bf16.gmra.mxu0 %vm714_vm1, %v4900_v23  ;;  %4791 = vmatmul.mubr.msk.bf16.gmra.mxu1 %vm714_vm1, %v4900_v23 }
 0x117   : > { %4758 = vmatprep.mubr.msk.bf16.mxu0 %vm714_vm1, %v4901_v24  ;;  %4794 = vmatprep.mubr.msk.bf16.mxu1 %vm714_vm1, %v4901_v24 }
 0x11e   : > { %4759 = vmatmul.mubr.msk.bf16.gmra.mxu0 %vm714_vm1, %v4902_v25  ;;  %4795 = vmatmul.mubr.msk.bf16.gmra.mxu1 %vm714_vm1, %v4902_v25  ;;  %v4251_v25 = vld [vmem:[%s313_s22] sm:$0x1] }
 0x11f   : > { %4762 = vmatprep.mubr.msk.bf16.mxu0 %vm714_vm1, %v4903_v26  ;;  %4798 = vmatprep.mubr.msk.bf16.mxu1 %vm714_vm1, %v4903_v26 }
 0x126   : > { %4763 = vmatmul.mubr.msk.bf16.gmra.mxu0 %vm714_vm1, %v4904_v27  ;;  %4799 = vmatmul.mubr.msk.bf16.gmra.mxu1 %vm714_vm1, %v4904_v27 }
 0x127   : > { %4327 = vmatprep.mubr.f32.mxu0 %v5084_v18 }
 0x12e   : > { %4649 = vmatmul.mubr.msk.f32.vlgmr.msra.gmra.mxu0 %vm714_vm1, %v4251_v25 }
 0x196   : > { %v4736_v28 = vpop.f32.mrf.mxu0  ;;  %v4772_v29 = vpop.f32.mrf.mxu1 }
 0x197   : > { %v1095_v30 = vmax.f32 %v4736_v28, %v4772_v29 }
 0x198   : > { %v797_v31 = vpop.f32.mrf.mxu0  ;;  %v966_v32 = vpop.f32.mrf.mxu1 }
 0x199   : > { %v1093_v33 = vmax.f32 %v797_v31, %v966_v32  ;;  %1260 = vmax.xlane.f32.xlu1 %v1095_v30 }
 0x19a   : > { %v4737_v34 = vpop.f32.mrf.mxu0  ;;  %v4773_v35 = vpop.f32.mrf.mxu1 }
 0x19b   : > { %v1096_v36 = vmax.f32 %v4737_v34, %v4773_v35  ;;  %1256 = vmax.xlane.f32.xlu0 %v1093_v33 }
 0x19c   : > { %v800_v37 = vpop.f32.mrf.mxu0  ;;  %v969_v38 = vpop.f32.mrf.mxu1 }
 0x19d   : > { %1262 = vmax.xlane.f32.xlu1 %v1096_v36  ;;  %v1094_v39 = vmax.f32 %v800_v37, %v969_v38 }
 0x1a1   : > { %1258 = vmax.xlane.f32.xlu1 %v1094_v39 }
 0x1a6   : > { %v4740_v40 = vpop.f32.mrf.mxu0  ;;  %v4776_v41 = vpop.f32.mrf.mxu1 }
 0x1a7   : > { %v1099_v42 = vmax.f32 %v4740_v40, %v4776_v41 }
 0x1a8   : > { %v813_v43 = vpop.f32.mrf.mxu0  ;;  %v982_v44 = vpop.f32.mrf.mxu1 }
 0x1a9   : > { %1268 = vmax.xlane.f32.xlu0 %v1099_v42  ;;  %v1097_v47 = vmax.f32 %v813_v43, %v982_v44 }
 0x1aa   : > { %v4741_v45 = vpop.f32.mrf.mxu0  ;;  %v4777_v46 = vpop.f32.mrf.mxu1 }
 0x1ab   : > { %v1100_v48 = vmax.f32 %v4741_v45, %v4777_v46 }
 0x1ac   : > { %v816_v50 = vpop.f32.mrf.mxu0  ;;  %v985_v51 = vpop.f32.mrf.mxu1 }
 0x1ad   : > { %1264 = vmax.xlane.f32.xlu0 %v1097_v47  ;;  %1270 = vmax.xlane.f32.xlu1 %v1100_v48  ;;  %v1098_v52 = vmax.f32 %v816_v50, %v985_v51 }
 0x1b1   : > { %1266 = vmax.xlane.f32.xlu1 %v1098_v52 }
 0x1b6   : > { %v4744_v53 = vpop.f32.mrf.mxu0  ;;  %v4780_v54 = vpop.f32.mrf.mxu1 }
 0x1b7   : > { %v1103_v55 = vmax.f32 %v4744_v53, %v4780_v54 }
 0x1b8   : > { %v829_v56 = vpop.f32.mrf.mxu0  ;;  %v998_v57 = vpop.f32.mrf.mxu1 }
 0x1b9   : > { %1276 = vmax.xlane.f32.xlu0 %v1103_v55  ;;  %v1101_v60 = vmax.f32 %v829_v56, %v998_v57 }
 0x1ba   : > { %v4745_v58 = vpop.f32.mrf.mxu0  ;;  %v4781_v59 = vpop.f32.mrf.mxu1 }
 0x1bb   : > { %v1104_v61 = vmax.f32 %v4745_v58, %v4781_v59 }
 0x1bc   : > { %v832_v62 = vpop.f32.mrf.mxu0  ;;  %v1001_v63 = vpop.f32.mrf.mxu1 }
 0x1bd   : > { %1272 = vmax.xlane.f32.xlu0 %v1101_v60  ;;  %1278 = vmax.xlane.f32.xlu1 %v1104_v61  ;;  %v1102_v0 = vmax.f32 %v832_v62, %v1001_v63  ;;  %v1352_v63 = vlaneseq }
 0x1bf   : > { %vm5879_vm2 = vcmp.lt.s32.totalorder %v1352_v63, 256 }
 0x1c1   : > { %1274 = vmax.xlane.f32.xlu1 %v1102_v0  ;;  %v5085_v0 = vmov 1966171168  }
 0x1c6   : > { %v4748_v1 = vpop.f32.mrf.mxu0  ;;  %v4784_v2 = vpop.f32.mrf.mxu1 }
 0x1c7   : > { %v1107_v3 = vmax.f32 %v4748_v1, %v4784_v2  ;;  %v2381_v1 = vunpack.c.l.s4 %v5085_v0  ;;  %v5334_v2 = vshrl.u32 %v1352_v63, 7 }
 0x1c8   : > { %v845_v4 = vpop.f32.mrf.mxu0  ;;  %v1014_v5 = vpop.f32.mrf.mxu1 }
 0x1c9   : > { %1284 = vmax.xlane.f32.xlu0 %v1107_v3  ;;  %v1105_v8 = vmax.f32 %v845_v4, %v1014_v5  ;;  %v2382_v3 = vunpack.c.0.s8 %v2381_v1  ;;  %v5337_v4 = vsub.s32 0, %v5334_v2  ;;  %v5340_v5 = vsub.s32 1, %v5334_v2 }
 0x1ca   : > { %v4749_v6 = vpop.f32.mrf.mxu0  ;;  %v4785_v7 = vpop.f32.mrf.mxu1 }
 0x1cb   : > { %v1108_v9 = vmax.f32 %v4749_v6, %v4785_v7  ;;  %v5343_v6 = vsub.s32 2, %v5334_v2  ;;  %v5346_v7 = vsub.s32 3, %v5334_v2 }
 0x1cc   : > { %v848_v10 = vpop.f32.mrf.mxu0  ;;  %v1017_v11 = vpop.f32.mrf.mxu1 }
 0x1cd   : > { %1280 = vmax.xlane.f32.xlu0 %v1105_v8  ;;  %1286 = vmax.xlane.f32.xlu1 %v1108_v9  ;;  %v1106_v14 = vmax.f32 %v848_v10, %v1017_v11  ;;  %v5349_v8 = vsub.s32 4, %v5334_v2  ;;  %v5352_v9 = vsub.s32 5, %v5334_v2  ;;  %v5355_v10 = vsub.s32 6, %v5334_v2 }
 0x1ce   : > { %v4752_v12 = vpop.f32.mrf.mxu0  ;;  %v4788_v13 = vpop.f32.mrf.mxu1  ;;  %v5358_v11 = vsub.s32 7, %v5334_v2 }
 0x1cf   : > { %v1111_v15 = vmax.f32 %v4752_v12, %v4788_v13  ;;  %v5361_v13 = vsub.s32 %v2382_v3, %v5334_v2 }
 0x1d0   : > { %v861_v16 = vpop.f32.mrf.mxu0  ;;  %v1030_v17 = vpop.f32.mrf.mxu1 }
 0x1d1   : > { %1282 = vmax.xlane.f32.xlu1 %v1106_v14  ;;  %1292 = vmax.xlane.f32.xlu0 %v1111_v15  ;;  %v1109_v21 = vmax.f32 %v861_v16, %v1030_v17 }
 0x1d2   : > { %v4753_v19 = vpop.f32.mrf.mxu0  ;;  %v4789_v20 = vpop.f32.mrf.mxu1 }
 0x1d3   : > { %v1112_v22 = vmax.f32 %v4753_v19, %v4789_v20 }
 0x1d4   : > { %v864_v23 = vpop.f32.mrf.mxu0  ;;  %v1033_v24 = vpop.f32.mrf.mxu1 }
 0x1d5   : > { %1288 = vmax.xlane.f32.xlu0 %v1109_v21  ;;  %1294 = vmax.xlane.f32.xlu1 %v1112_v22  ;;  %v1110_v28 = vmax.f32 %v864_v23, %v1033_v24 }
 0x1d6   : > { %v4756_v26 = vpop.f32.mrf.mxu0  ;;  %v4792_v27 = vpop.f32.mrf.mxu1 }
 0x1d7   : > { %v1115_v29 = vmax.f32 %v4756_v26, %v4792_v27 }
 0x1d8   : > { %v877_v30 = vpop.f32.mrf.mxu0  ;;  %v1046_v31 = vpop.f32.mrf.mxu1 }
 0x1d9   : > { %1290 = vmax.xlane.f32.xlu1 %v1110_v28  ;;  %1300 = vmax.xlane.f32.xlu0 %v1115_v29  ;;  %v1113_v34 = vmax.f32 %v877_v30, %v1046_v31 }
 0x1da   : > { %v4757_v32 = vpop.f32.mrf.mxu0  ;;  %v4793_v33 = vpop.f32.mrf.mxu1 }
 0x1db   : > { %v1116_v35 = vmax.f32 %v4757_v32, %v4793_v33 }
 0x1dc   : > { %v880_v36 = vpop.f32.mrf.mxu0  ;;  %v1049_v37 = vpop.f32.mrf.mxu1 }
 0x1dd   : > { %1296 = vmax.xlane.f32.xlu0 %v1113_v34  ;;  %1302 = vmax.xlane.f32.xlu1 %v1116_v35  ;;  %v1114_v40 = vmax.f32 %v880_v36, %v1049_v37 }
 0x1de   : > { %v4760_v38 = vpop.f32.mrf.mxu0  ;;  %v4796_v39 = vpop.f32.mrf.mxu1 }
 0x1df   : > { %v1119_v41 = vmax.f32 %v4760_v38, %v4796_v39 }
 0x1e0   : > { %v893_v42 = vpop.f32.mrf.mxu0  ;;  %v1062_v43 = vpop.f32.mrf.mxu1 }
 0x1e1   : > { %1298 = vmax.xlane.f32.xlu1 %v1114_v40  ;;  %1308 = vmax.xlane.f32.xlu0 %v1119_v41  ;;  %v1117_v46 = vmax.f32 %v893_v42, %v1062_v43 }
 0x1e2   : > { %v4761_v44 = vpop.f32.mrf.mxu0  ;;  %v4797_v45 = vpop.f32.mrf.mxu1 }
 0x1e3   : > { %v1120_v47 = vmax.f32 %v4761_v44, %v4797_v45 }
 0x1e4   : > { %v896_v48 = vpop.f32.mrf.mxu0  ;;  %v1065_v49 = vpop.f32.mrf.mxu1 }
 0x1e5   : > { %1304 = vmax.xlane.f32.xlu0 %v1117_v46  ;;  %1310 = vmax.xlane.f32.xlu1 %v1120_v47  ;;  %v1118_v52 = vmax.f32 %v896_v48, %v1065_v49 }
 0x1e6   : > { %v4764_v50 = vpop.f32.mrf.mxu0  ;;  %v4800_v51 = vpop.f32.mrf.mxu1 }
 0x1e7   : > { %v1123_v61 = vmax.f32 %v4764_v50, %v4800_v51 }
 0x1e8   : > { %v909_v53 = vpop.f32.mrf.mxu0  ;;  %v1078_v54 = vpop.f32.mrf.mxu1 }
 0x1e9   : > { %v1121_v55 = vmax.f32 %v909_v53, %v1078_v54  ;;  %1306 = vmax.xlane.f32.xlu1 %v1118_v52 }
 0x1ea   : > { %v4765_v56 = vpop.f32.mrf.mxu0  ;;  %v4801_v57 = vpop.f32.mrf.mxu1 }
 0x1eb   : > { %v1124_v58 = vmax.f32 %v4765_v56, %v4801_v57  ;;  %1312 = vmax.xlane.f32.xlu0 %v1121_v55 }
 0x1ec   : > { %v912_v59 = vpop.f32.mrf.mxu0  ;;  %v1081_v60 = vpop.f32.mrf.mxu1 }
 0x1ed   : > { %1318 = vmax.xlane.f32.xlu1 %v1124_v58  ;;  %v1122_v62 = vmax.f32 %v912_v59, %v1081_v60 }
 0x1ef   : > { %1316 = vmax.xlane.f32.xlu0 %v1123_v61 }
 0x1f1   : > { %1314 = vmax.xlane.f32.xlu1 %v1122_v62 }
 0x222   : > { %v1261_v12 = vpop.xlane.xlu1 %1260 }
 0x223   : > { %v1419_v14 = vrot.slane %v1261_v12, %v5337_v4  ;;  %v1423_v15 = vrot.slane %v1261_v12, %v5340_v5  ;;  %v1427_v16 = vrot.slane %v1261_v12, %v5343_v6  ;;  %v1431_v17 = vrot.slane %v1261_v12, %v5346_v7 }
 0x224   : > { %v1257_v18 = vpop.xlane.xlu0 %1256  ;;  %v1435_v19 = vrot.slane %v1261_v12, %v5349_v8  ;;  %v1439_v20 = vrot.slane %v1261_v12, %v5352_v9  ;;  %v1443_v21 = vrot.slane %v1261_v12, %v5355_v10  ;;  %v1447_v22 = vrot.slane %v1261_v12, %v5358_v11 }
 0x225   : > { %v2474_v23 = vcombine.low %v1419_v14, %v1423_v15  ;;  %v2475_v24 = vcombine.low %v1427_v16, %v1431_v17  ;;  %v1355_v25 = vrot.slane %v1257_v18, %v5337_v4  ;;  %v1359_v26 = vrot.slane %v1257_v18, %v5340_v5 }
 0x226   : > { %v1263_v27 = vpop.xlane.xlu1 %1262  ;;  %v2476_v28 = vcombine.low %v1435_v19, %v1439_v20  ;;  %v2477_v29 = vcombine.low %v1443_v21, %v1447_v22  ;;  %v1363_v30 = vrot.slane %v1257_v18, %v5343_v6  ;;  %v1367_v31 = vrot.slane %v1257_v18, %v5346_v7 }
 0x227   : > { %v2484_v32 = vrot.slane %v2474_v23, %v5361_v13  ;;  %v2491_v33 = vrot.slane %v2475_v24, %v5361_v13  ;;  %v1371_v34 = vrot.slane %v1257_v18, %v5349_v8  ;;  %v1375_v35 = vrot.slane %v1257_v18, %v5352_v9 }
 0x228   : > { %v2498_v36 = vrot.slane %v2476_v28, %v5361_v13  ;;  %v2505_v37 = vrot.slane %v2477_v29, %v5361_v13  ;;  %v1379_v38 = vrot.slane %v1257_v18, %v5355_v10  ;;  %v1383_v39 = vrot.slane %v1257_v18, %v5358_v11 }
 0x229   : > { %v2506_v40 = vcombine.low %v2484_v32, %v2491_v33  ;;  %v2376_v41 = vcombine.low %v1355_v25, %v1359_v26  ;;  %v2377_v42 = vcombine.low %v1363_v30, %v1367_v31  ;;  %v2378_v43 = vcombine.low %v1371_v34, %v1375_v35 }
 0x22a   : > { %v2507_v44 = vcombine.low %v2498_v36, %v2505_v37  ;;  %v2379_v45 = vcombine.low %v1379_v38, %v1383_v39  ;;  %v1451_v46 = vrot.slane %v1263_v27, %v5337_v4  ;;  %v1455_v47 = vrot.slane %v1263_v27, %v5340_v5  ;;  %v1259_v52 = vpop.xlane.xlu1 %1258 }
 0x22b   : > { %v2514_v48 = vrot.slane %v2506_v40, %v5361_v13  ;;  %v2386_v49 = vrot.slane %v2376_v41, %v5361_v13  ;;  %v2393_v50 = vrot.slane %v2377_v42, %v5361_v13  ;;  %v2400_v51 = vrot.slane %v2378_v43, %v5361_v13 }
 0x22c   : > { %v2521_v53 = vrot.slane %v2507_v44, %v5361_v13  ;;  %v2407_v54 = vrot.slane %v2379_v45, %v5361_v13  ;;  %v1459_v55 = vrot.slane %v1263_v27, %v5343_v6  ;;  %v1463_v56 = vrot.slane %v1263_v27, %v5346_v7 }
 0x22d   : > { %v2408_v57 = vcombine.low %v2386_v49, %v2393_v50  ;;  %v1467_v58 = vrot.slane %v1263_v27, %v5349_v8  ;;  %v1471_v59 = vrot.slane %v1263_v27, %v5352_v9  ;;  %v1475_v60 = vrot.slane %v1263_v27, %v5355_v10 }
 0x22e   : > { %v2522_v61 = vcombine.low %v2514_v48, %v2521_v53  ;;  %v2409_v62 = vcombine.low %v2400_v51, %v2407_v54  ;;  %v1479_v0 = vrot.slane %v1263_v27, %v5358_v11  ;;  %v2523_v1 = vcombine.low %v1451_v46, %v1455_v47 }
 0x22f   : > { %v2416_v3 = vrot.slane %v2408_v57, %v5361_v13  ;;  %v2524_v12 = vcombine.low %v1459_v55, %v1463_v56  ;;  %v2525_v14 = vcombine.low %v1467_v58, %v1471_v59  ;;  %v1387_v15 = vrot.slane %v1259_v52, %v5337_v4 }
 0x230   : > { %3951 = vperm.xlu1 %4881, %v2522_v61   ;;  %v2423_v16 = vrot.slane %v2409_v62, %v5361_v13  ;;  %v2526_v17 = vcombine.low %v1475_v60, %v1479_v0  ;;  %v2533_v18 = vrot.slane %v2523_v1, %v5361_v13  ;;  %v1391_v19 = vrot.slane %v1259_v52, %v5340_v5 }
 0x231   : > { %v2540_v20 = vrot.slane %v2524_v12, %v5361_v13  ;;  %v2547_v21 = vrot.slane %v2525_v14, %v5361_v13  ;;  %v1395_v22 = vrot.slane %v1259_v52, %v5343_v6  ;;  %v1399_v23 = vrot.slane %v1259_v52, %v5346_v7 }
 0x232   : > { %v2424_v24 = vcombine.low %v2416_v3, %v2423_v16  ;;  %v1269_v25 = vpop.xlane.xlu0 %1268  ;;  %v2554_v26 = vrot.slane %v2526_v17, %v5361_v13  ;;  %v1403_v27 = vrot.slane %v1259_v52, %v5349_v8  ;;  %v1407_v28 = vrot.slane %v1259_v52, %v5352_v9 }
 0x233   : > { %v2555_v29 = vcombine.low %v2533_v18, %v2540_v20  ;;  %v1411_v30 = vrot.slane %v1259_v52, %v5355_v10  ;;  %v1415_v31 = vrot.slane %v1259_v52, %v5358_v11  ;;  %v2425_v32 = vcombine.low %v1387_v15, %v1391_v19 }
 0x234   : > { %3945 = vperm.xlu0 %4882, %v2424_v24   ;;  %v2556_v33 = vcombine.low %v2547_v21, %v2554_v26  ;;  %v2426_v34 = vcombine.low %v1395_v22, %v1399_v23  ;;  %v2427_v35 = vcombine.low %v1403_v27, %v1407_v28  ;;  %v1547_v36 = vrot.slane %v1269_v25, %v5337_v4 }
 0x235   : > { %v2563_v37 = vrot.slane %v2555_v29, %v5361_v13  ;;  %v2428_v38 = vcombine.low %v1411_v30, %v1415_v31  ;;  %v2435_v39 = vrot.slane %v2425_v32, %v5361_v13  ;;  %v1551_v40 = vrot.slane %v1269_v25, %v5340_v5 }
 0x236   : > { %v2570_v41 = vrot.slane %v2556_v33, %v5361_v13  ;;  %v2442_v42 = vrot.slane %v2426_v34, %v5361_v13  ;;  %v2449_v43 = vrot.slane %v2427_v35, %v5361_v13  ;;  %v1555_v44 = vrot.slane %v1269_v25, %v5343_v6  ;;  %v1265_v45 = vpop.xlane.xlu0 %1264  ;;  %v1271_v62 = vpop.xlane.xlu1 %1270 }
 0x237   : > { %v2456_v46 = vrot.slane %v2428_v38, %v5361_v13  ;;  %v1559_v47 = vrot.slane %v1269_v25, %v5346_v7  ;;  %v1563_v48 = vrot.slane %v1269_v25, %v5349_v8  ;;  %v1567_v49 = vrot.slane %v1269_v25, %v5352_v9 }
 0x238   : > { %v2571_v50 = vcombine.low %v2563_v37, %v2570_v41  ;;  %v2457_v51 = vcombine.low %v2435_v39, %v2442_v42  ;;  %v1571_v52 = vrot.slane %v1269_v25, %v5355_v10  ;;  %v1575_v53 = vrot.slane %v1269_v25, %v5358_v11 }
 0x239   : > { %v2458_v54 = vcombine.low %v2449_v43, %v2456_v46  ;;  %v2670_v55 = vcombine.low %v1547_v36, %v1551_v40  ;;  %v2671_v56 = vcombine.low %v1555_v44, %v1559_v47  ;;  %v2672_v57 = vcombine.low %v1563_v48, %v1567_v49 }
 0x23a   : > { %3954 = vperm.xlu1 %4881, %v2571_v50   ;;  %v2465_v58 = vrot.slane %v2457_v51, %v5361_v13  ;;  %v2673_v59 = vcombine.low %v1571_v52, %v1575_v53  ;;  %v1483_v60 = vrot.slane %v1265_v45, %v5337_v4  ;;  %v1487_v61 = vrot.slane %v1265_v45, %v5340_v5  ;;  %v1267_v34 = vpop.xlane.xlu1 %1266 }
 0x23b   : > { %v2472_v0 = vrot.slane %v2458_v54, %v5361_v13  ;;  %v2680_v1 = vrot.slane %v2670_v55, %v5361_v13  ;;  %v2687_v3 = vrot.slane %v2671_v56, %v5361_v13  ;;  %v2694_v12 = vrot.slane %v2672_v57, %v5361_v13 }
 0x23c   : > { %v2701_v14 = vrot.slane %v2673_v59, %v5361_v13  ;;  %v1491_v15 = vrot.slane %v1265_v45, %v5343_v6  ;;  %v1495_v16 = vrot.slane %v1265_v45, %v5346_v7  ;;  %v1499_v17 = vrot.slane %v1265_v45, %v5349_v8 }
 0x23d   : > { %v2473_v18 = vcombine.low %v2465_v58, %v2472_v0  ;;  %v2702_v19 = vcombine.low %v2680_v1, %v2687_v3  ;;  %v1503_v20 = vrot.slane %v1265_v45, %v5352_v9  ;;  %v1507_v21 = vrot.slane %v1265_v45, %v5355_v10 }
 0x23e   : > { %v2703_v22 = vcombine.low %v2694_v12, %v2701_v14  ;;  %v1511_v23 = vrot.slane %v1265_v45, %v5358_v11  ;;  %v2572_v24 = vcombine.low %v1483_v60, %v1487_v61  ;;  %v2573_v25 = vcombine.low %v1491_v15, %v1495_v16 }
 0x23f   : > { %3948 = vperm.xlu1 %4881, %v2473_v18   ;;  %v2710_v26 = vrot.slane %v2702_v19, %v5361_v13  ;;  %v2574_v27 = vcombine.low %v1499_v17, %v1503_v20  ;;  %v1579_v28 = vrot.slane %v1271_v62, %v5337_v4  ;;  %v1583_v29 = vrot.slane %v1271_v62, %v5340_v5 }
 0x240   : > { %v2717_v30 = vrot.slane %v2703_v22, %v5361_v13  ;;  %v2575_v31 = vcombine.low %v1507_v21, %v1511_v23  ;;  %v2582_v32 = vrot.slane %v2572_v24, %v5361_v13  ;;  %v2589_v33 = vrot.slane %v2573_v25, %v5361_v13 }
 0x241   : > { %v2596_v35 = vrot.slane %v2574_v27, %v5361_v13  ;;  %v1587_v36 = vrot.slane %v1271_v62, %v5343_v6  ;;  %v1591_v37 = vrot.slane %v1271_v62, %v5346_v7  ;;  %v1595_v38 = vrot.slane %v1271_v62, %v5349_v8 }
 0x242   : > { %v2718_v39 = vcombine.low %v2710_v26, %v2717_v30  ;;  %v2603_v40 = vrot.slane %v2575_v31, %v5361_v13  ;;  %v2604_v41 = vcombine.low %v2582_v32, %v2589_v33  ;;  %v1599_v42 = vrot.slane %v1271_v62, %v5352_v9  ;;  %v1277_v55 = vpop.xlane.xlu0 %1276 }
 0x243   : > { %v1603_v43 = vrot.slane %v1271_v62, %v5355_v10  ;;  %v1607_v44 = vrot.slane %v1271_v62, %v5358_v11  ;;  %v2719_v45 = vcombine.low %v1579_v28, %v1583_v29  ;;  %v2720_v46 = vcombine.low %v1587_v36, %v1591_v37 }
 0x244   : > { %3963 = vperm.xlu1 %4881, %v2718_v39   ;;  %v2605_v47 = vcombine.low %v2596_v35, %v2603_v40  ;;  %v2612_v48 = vrot.slane %v2604_v41, %v5361_v13  ;;  %v2721_v49 = vcombine.low %v1595_v38, %v1599_v42  ;;  %v1515_v50 = vrot.slane %v1267_v34, %v5337_v4 }
 0x245   : > { %v2722_v51 = vcombine.low %v1603_v43, %v1607_v44  ;;  %v2729_v52 = vrot.slane %v2719_v45, %v5361_v13  ;;  %v2736_v53 = vrot.slane %v2720_v46, %v5361_v13  ;;  %v1519_v54 = vrot.slane %v1267_v34, %v5340_v5 }
 0x246   : > { %v2619_v56 = vrot.slane %v2605_v47, %v5361_v13  ;;  %v2743_v57 = vrot.slane %v2721_v49, %v5361_v13  ;;  %v1523_v58 = vrot.slane %v1267_v34, %v5343_v6  ;;  %v1527_v59 = vrot.slane %v1267_v34, %v5346_v7  ;;  %v5471_v23 = vpop.xlane.xlu1 %1278  ;;  %v1273_v28 = vpop.xlane.xlu0 %1272 }
 0x247   : > { %v2750_v60 = vrot.slane %v2722_v51, %v5361_v13  ;;  %v2751_v61 = vcombine.low %v2729_v52, %v2736_v53  ;;  %v1531_v62 = vrot.slane %v1267_v34, %v5349_v8  ;;  %v1535_v0 = vrot.slane %v1267_v34, %v5352_v9 }
 0x248   : > { %v2620_v1 = vcombine.low %v2612_v48, %v2619_v56  ;;  %v1539_v3 = vrot.slane %v1267_v34, %v5355_v10  ;;  %v1543_v12 = vrot.slane %v1267_v34, %v5358_v11  ;;  %v2621_v14 = vcombine.low %v1515_v50, %v1519_v54 }
 0x249   : > { %v2752_v15 = vcombine.low %v2743_v57, %v2750_v60  ;;  %v2759_v16 = vrot.slane %v2751_v61, %v5361_v13  ;;  %v2622_v17 = vcombine.low %v1523_v58, %v1527_v59  ;;  %v2623_v18 = vcombine.low %v1531_v62, %v1535_v0 }
 0x24a   : > { %3957 = vperm.xlu1 %4881, %v2620_v1   ;;  %v2624_v19 = vcombine.low %v1539_v3, %v1543_v12  ;;  %v2631_v20 = vrot.slane %v2621_v14, %v5361_v13  ;;  %v1675_v21 = vrot.slane %v1277_v55, %v5337_v4  ;;  %v1679_v22 = vrot.slane %v1277_v55, %v5340_v5  ;;  %v1275_v49 = vpop.xlane.xlu1 %1274 }
 0x24b   : > { %v2766_v24 = vrot.slane %v2752_v15, %v5361_v13  ;;  %v2638_v25 = vrot.slane %v2622_v17, %v5361_v13  ;;  %v2645_v26 = vrot.slane %v2623_v18, %v5361_v13  ;;  %v1683_v27 = vrot.slane %v1277_v55, %v5343_v6 }
 0x24c   : > { %v2652_v29 = vrot.slane %v2624_v19, %v5361_v13  ;;  %v1687_v30 = vrot.slane %v1277_v55, %v5346_v7  ;;  %v1691_v31 = vrot.slane %v1277_v55, %v5349_v8  ;;  %v1695_v32 = vrot.slane %v1277_v55, %v5352_v9 }
 0x24d   : > { %v2767_v33 = vcombine.low %v2759_v16, %v2766_v24  ;;  %v2653_v34 = vcombine.low %v2631_v20, %v2638_v25  ;;  %v1699_v35 = vrot.slane %v1277_v55, %v5355_v10  ;;  %v1703_v36 = vrot.slane %v1277_v55, %v5358_v11 }
 0x24e   : > { %v2654_v37 = vcombine.low %v2645_v26, %v2652_v29  ;;  %v2866_v38 = vcombine.low %v1675_v21, %v1679_v22  ;;  %v2867_v39 = vcombine.low %v1683_v27, %v1687_v30  ;;  %v2868_v40 = vcombine.low %v1691_v31, %v1695_v32 }
 0x24f   : > { %3966 = vperm.xlu1 %4881, %v2767_v33   ;;  %v2661_v41 = vrot.slane %v2653_v34, %v5361_v13  ;;  %v2869_v42 = vcombine.low %v1699_v35, %v1703_v36  ;;  %v1611_v43 = vrot.slane %v1273_v28, %v5337_v4  ;;  %v1615_v44 = vrot.slane %v1273_v28, %v5340_v5 }
 0x250   : > { %v2668_v45 = vrot.slane %v2654_v37, %v5361_v13  ;;  %v2876_v46 = vrot.slane %v2866_v38, %v5361_v13  ;;  %v2883_v47 = vrot.slane %v2867_v39, %v5361_v13  ;;  %v2890_v48 = vrot.slane %v2868_v40, %v5361_v13 }
 0x251   : > { %v2897_v50 = vrot.slane %v2869_v42, %v5361_v13  ;;  %v1619_v51 = vrot.slane %v1273_v28, %v5343_v6  ;;  %v1623_v52 = vrot.slane %v1273_v28, %v5346_v7  ;;  %v1627_v53 = vrot.slane %v1273_v28, %v5349_v8 }
 0x252   : > { %v2669_v54 = vcombine.low %v2661_v41, %v2668_v45  ;;  %v2898_v55 = vcombine.low %v2876_v46, %v2883_v47  ;;  %v1631_v56 = vrot.slane %v1273_v28, %v5352_v9  ;;  %v1635_v57 = vrot.slane %v1273_v28, %v5355_v10  ;;  %v5503_v17 = vpop.xlane.xlu0 %1284 }
 0x253   : > { %v2899_v58 = vcombine.low %v2890_v48, %v2897_v50  ;;  %v1639_v59 = vrot.slane %v1273_v28, %v5358_v11  ;;  %v2768_v60 = vcombine.low %v1611_v43, %v1615_v44  ;;  %v2769_v61 = vcombine.low %v1619_v51, %v1623_v52 }
 0x254   : > { %3960 = vperm.xlu1 %4881, %v2669_v54   ;;  %v2906_v62 = vrot.slane %v2898_v55, %v5361_v13  ;;  %v2770_v0 = vcombine.low %v1627_v53, %v1631_v56  ;;  %v1643_v1 = vrot.slane %v1275_v49, %v5337_v4  ;;  %v1647_v3 = vrot.slane %v1275_v49, %v5340_v5 }
 0x255   : > { %v2913_v12 = vrot.slane %v2899_v58, %v5361_v13  ;;  %v2771_v14 = vcombine.low %v1635_v57, %v1639_v59  ;;  %v2778_v15 = vrot.slane %v2768_v60, %v5361_v13  ;;  %v2785_v16 = vrot.slane %v2769_v61, %v5361_v13 }
 0x256   : > { %v2792_v18 = vrot.slane %v2770_v0, %v5361_v13  ;;  %v1651_v19 = vrot.slane %v1275_v49, %v5343_v6  ;;  %v1655_v20 = vrot.slane %v1275_v49, %v5346_v7  ;;  %v1659_v21 = vrot.slane %v1275_v49, %v5349_v8  ;;  %v5521_v40 = vpop.xlane.xlu1 %1286  ;;  %v1281_v44 = vpop.xlane.xlu0 %1280 }
 0x257   : > { %v2914_v22 = vcombine.low %v2906_v62, %v2913_v12  ;;  %v2799_v24 = vrot.slane %v2771_v14, %v5361_v13  ;;  %v2800_v25 = vcombine.low %v2778_v15, %v2785_v16  ;;  %v1663_v26 = vrot.slane %v1275_v49, %v5352_v9 }
 0x258   : > { %v1667_v27 = vrot.slane %v1275_v49, %v5355_v10  ;;  %v1671_v28 = vrot.slane %v1275_v49, %v5358_v11  ;;  %v2817_v29 = vcombine.low %v1643_v1, %v1647_v3  ;;  %v2818_v30 = vcombine.low %v1651_v19, %v1655_v20 }
 0x259   : > { %3975 = vperm.xlu1 %4881, %v2914_v22   ;;  %v2801_v31 = vcombine.low %v2792_v18, %v2799_v24  ;;  %v2808_v32 = vrot.slane %v2800_v25, %v5361_v13  ;;  %v2819_v33 = vcombine.low %v1659_v21, %v1663_v26  ;;  %v1707_v34 = vrot.slane %v5471_v23, %v5337_v4 }
 0x25a   : > { %v2820_v35 = vcombine.low %v1667_v27, %v1671_v28  ;;  %v2827_v36 = vrot.slane %v2817_v29, %v5361_v13  ;;  %v2834_v37 = vrot.slane %v2818_v30, %v5361_v13  ;;  %v1711_v38 = vrot.slane %v5471_v23, %v5340_v5  ;;  %v1283_v3 = vpop.xlane.xlu1 %1282 }
 0x25b   : > { %v2815_v39 = vrot.slane %v2801_v31, %v5361_v13  ;;  %v2841_v41 = vrot.slane %v2819_v33, %v5361_v13  ;;  %v1715_v42 = vrot.slane %v5471_v23, %v5343_v6  ;;  %v1719_v43 = vrot.slane %v5471_v23, %v5346_v7 }
 0x25c   : > { %v2848_v45 = vrot.slane %v2820_v35, %v5361_v13  ;;  %v2849_v46 = vcombine.low %v2827_v36, %v2834_v37  ;;  %v1723_v47 = vrot.slane %v5471_v23, %v5349_v8  ;;  %v1727_v48 = vrot.slane %v5471_v23, %v5352_v9 }
 0x25d   : > { %v2816_v49 = vcombine.low %v2808_v32, %v2815_v39  ;;  %v1731_v50 = vrot.slane %v5471_v23, %v5355_v10  ;;  %v1735_v51 = vrot.slane %v5471_v23, %v5358_v11  ;;  %v2915_v52 = vcombine.low %v1707_v34, %v1711_v38  ;;  %v1293_v34 = vpop.xlane.xlu0 %1292 }
 0x25e   : > { %v2850_v53 = vcombine.low %v2841_v41, %v2848_v45  ;;  %v2857_v54 = vrot.slane %v2849_v46, %v5361_v13  ;;  %v2916_v55 = vcombine.low %v1715_v42, %v1719_v43  ;;  %v2917_v56 = vcombine.low %v1723_v47, %v1727_v48 }
 0x25f   : > { %3969 = vperm.xlu1 %4881, %v2816_v49   ;;  %v2918_v57 = vcombine.low %v1731_v50, %v1735_v51  ;;  %v2925_v58 = vrot.slane %v2915_v52, %v5361_v13  ;;  %v1739_v59 = vrot.slane %v1281_v44, %v5337_v4  ;;  %v1743_v60 = vrot.slane %v1281_v44, %v5340_v5 }
 0x260   : > { %v2864_v61 = vrot.slane %v2850_v53, %v5361_v13  ;;  %v2932_v62 = vrot.slane %v2916_v55, %v5361_v13  ;;  %v2939_v23 = vrot.slane %v2917_v56, %v5361_v13  ;;  %v1747_v0 = vrot.slane %v1281_v44, %v5343_v6  ;;  %v1295_v56 = vpop.xlane.xlu1 %1294 }
 0x261   : > { %v2946_v1 = vrot.slane %v2918_v57, %v5361_v13  ;;  %v1751_v12 = vrot.slane %v1281_v44, %v5346_v7  ;;  %v1755_v14 = vrot.slane %v1281_v44, %v5349_v8  ;;  %v1759_v15 = vrot.slane %v1281_v44, %v5352_v9 }
 0x262   : > { %v2865_v16 = vcombine.low %v2857_v54, %v2864_v61  ;;  %v2947_v18 = vcombine.low %v2925_v58, %v2932_v62  ;;  %v1763_v19 = vrot.slane %v1281_v44, %v5355_v10  ;;  %v1767_v20 = vrot.slane %v1281_v44, %v5358_v11 }
 0x263   : > { %v2948_v21 = vcombine.low %v2939_v23, %v2946_v1  ;;  %v2964_v22 = vcombine.low %v1739_v59, %v1743_v60  ;;  %v2965_v24 = vcombine.low %v1747_v0, %v1751_v12  ;;  %v2966_v25 = vcombine.low %v1755_v14, %v1759_v15 }
 0x264   : > { %3972 = vperm.xlu0 %4882, %v2865_v16   ;;  %v2955_v26 = vrot.slane %v2947_v18, %v5361_v13  ;;  %v2967_v27 = vcombine.low %v1763_v19, %v1767_v20  ;;  %v1771_v28 = vrot.slane %v1283_v3, %v5337_v4  ;;  %v1775_v29 = vrot.slane %v1283_v3, %v5340_v5 }
 0x265   : > { %v2962_v30 = vrot.slane %v2948_v21, %v5361_v13  ;;  %v2974_v31 = vrot.slane %v2964_v22, %v5361_v13  ;;  %v2981_v32 = vrot.slane %v2965_v24, %v5361_v13  ;;  %v2988_v33 = vrot.slane %v2966_v25, %v5361_v13 }
 0x266   : > { %v2995_v35 = vrot.slane %v2967_v27, %v5361_v13  ;;  %v1779_v36 = vrot.slane %v1283_v3, %v5343_v6  ;;  %v1783_v37 = vrot.slane %v1283_v3, %v5346_v7  ;;  %v1787_v38 = vrot.slane %v1283_v3, %v5349_v8 }
 0x267   : > { %v2963_v39 = vcombine.low %v2955_v26, %v2962_v30  ;;  %v2996_v41 = vcombine.low %v2974_v31, %v2981_v32  ;;  %v1791_v42 = vrot.slane %v1283_v3, %v5352_v9  ;;  %v1795_v43 = vrot.slane %v1283_v3, %v5355_v10 }
 0x268   : > { %v2997_v44 = vcombine.low %v2988_v33, %v2995_v35  ;;  %v1799_v45 = vrot.slane %v1283_v3, %v5358_v11  ;;  %v3013_v46 = vcombine.low %v1771_v28, %v1775_v29  ;;  %v3014_v47 = vcombine.low %v1779_v36, %v1783_v37  ;;  %v1289_v29 = vpop.xlane.xlu0 %1288 }
 0x269   : > { %3978 = vperm.xlu1 %4881, %v2963_v39   ;;  %v3004_v48 = vrot.slane %v2996_v41, %v5361_v13  ;;  %v3015_v49 = vcombine.low %v1787_v38, %v1791_v42  ;;  %v1931_v50 = vrot.slane %v1293_v34, %v5337_v4  ;;  %v1935_v51 = vrot.slane %v1293_v34, %v5340_v5 }
 0x26a   : > { %v3011_v52 = vrot.slane %v2997_v44, %v5361_v13  ;;  %v3016_v53 = vcombine.low %v1795_v43, %v1799_v45  ;;  %v3023_v54 = vrot.slane %v3013_v46, %v5361_v13  ;;  %v3030_v55 = vrot.slane %v3014_v47, %v5361_v13 }
 0x26b   : > { %v3037_v57 = vrot.slane %v3015_v49, %v5361_v13  ;;  %v1939_v58 = vrot.slane %v1293_v34, %v5343_v6  ;;  %v1943_v59 = vrot.slane %v1293_v34, %v5346_v7  ;;  %v1947_v60 = vrot.slane %v1293_v34, %v5349_v8 }
 0x26c   : > { %v3012_v61 = vcombine.low %v3004_v48, %v3011_v52  ;;  %v3044_v62 = vrot.slane %v3016_v53, %v5361_v13  ;;  %v3045_v23 = vcombine.low %v3023_v54, %v3030_v55  ;;  %v1951_v0 = vrot.slane %v1293_v34, %v5352_v9 }
 0x26d   : > { %v1955_v1 = vrot.slane %v1293_v34, %v5355_v10  ;;  %v1959_v3 = vrot.slane %v1293_v34, %v5358_v11  ;;  %v3258_v12 = vcombine.low %v1931_v50, %v1935_v51  ;;  %v3259_v14 = vcombine.low %v1939_v58, %v1943_v59  ;;  %v1291_v51 = vpop.xlane.xlu1 %1290 }
 0x26e   : > { %3981 = vperm.xlu1 %4881, %v3012_v61   ;;  %v3046_v15 = vcombine.low %v3037_v57, %v3044_v62  ;;  %v3053_v16 = vrot.slane %v3045_v23, %v5361_v13  ;;  %v3260_v18 = vcombine.low %v1947_v60, %v1951_v0  ;;  %v1963_v19 = vrot.slane %v1295_v56, %v5337_v4 }
 0x26f   : > { %v3261_v20 = vcombine.low %v1955_v1, %v1959_v3  ;;  %v3268_v21 = vrot.slane %v3258_v12, %v5361_v13  ;;  %v3275_v22 = vrot.slane %v3259_v14, %v5361_v13  ;;  %v1967_v24 = vrot.slane %v1295_v56, %v5340_v5 }
 0x270   : > { %v3060_v25 = vrot.slane %v3046_v15, %v5361_v13  ;;  %v3282_v26 = vrot.slane %v3260_v18, %v5361_v13  ;;  %v1971_v27 = vrot.slane %v1295_v56, %v5343_v6  ;;  %v1975_v28 = vrot.slane %v1295_v56, %v5346_v7 }
 0x271   : > { %v3289_v30 = vrot.slane %v3261_v20, %v5361_v13  ;;  %v3290_v31 = vcombine.low %v3268_v21, %v3275_v22  ;;  %v1979_v32 = vrot.slane %v1295_v56, %v5349_v8  ;;  %v1983_v33 = vrot.slane %v1295_v56, %v5352_v9 }
 0x272   : > { %v3061_v34 = vcombine.low %v3053_v16, %v3060_v25  ;;  %v1987_v35 = vrot.slane %v1295_v56, %v5355_v10  ;;  %v1991_v36 = vrot.slane %v1295_v56, %v5358_v11  ;;  %v3307_v37 = vcombine.low %v1963_v19, %v1967_v24  ;;  %v1301_v19 = vpop.xlane.xlu0 %1300 }
 0x273   : > { %v3291_v38 = vcombine.low %v3282_v26, %v3289_v30  ;;  %v3298_v39 = vrot.slane %v3290_v31, %v5361_v13  ;;  %v3308_v41 = vcombine.low %v1971_v27, %v1975_v28  ;;  %v3309_v42 = vcombine.low %v1979_v32, %v1983_v33 }
 0x274   : > { %3984 = vperm.xlu1 %4881, %v3061_v34   ;;  %v3310_v43 = vcombine.low %v1987_v35, %v1991_v36  ;;  %v3317_v44 = vrot.slane %v3307_v37, %v5361_v13  ;;  %v1867_v45 = vrot.slane %v1289_v29, %v5337_v4  ;;  %v1871_v46 = vrot.slane %v1289_v29, %v5340_v5 }
 0x275   : > { %v3305_v47 = vrot.slane %v3291_v38, %v5361_v13  ;;  %v3324_v48 = vrot.slane %v3308_v41, %v5361_v13  ;;  %v3331_v49 = vrot.slane %v3309_v42, %v5361_v13  ;;  %v1875_v50 = vrot.slane %v1289_v29, %v5343_v6  ;;  %v1303_v42 = vpop.xlane.xlu1 %1302 }
 0x276   : > { %v3338_v52 = vrot.slane %v3310_v43, %v5361_v13  ;;  %v1879_v53 = vrot.slane %v1289_v29, %v5346_v7  ;;  %v1883_v54 = vrot.slane %v1289_v29, %v5349_v8  ;;  %v1887_v55 = vrot.slane %v1289_v29, %v5352_v9 }
 0x277   : > { %v3306_v56 = vcombine.low %v3298_v39, %v3305_v47  ;;  %v3339_v57 = vcombine.low %v3317_v44, %v3324_v48  ;;  %v1891_v58 = vrot.slane %v1289_v29, %v5355_v10  ;;  %v1895_v59 = vrot.slane %v1289_v29, %v5358_v11 }
 0x278   : > { %v3340_v60 = vcombine.low %v3331_v49, %v3338_v52  ;;  %v3160_v61 = vcombine.low %v1867_v45, %v1871_v46  ;;  %v3161_v62 = vcombine.low %v1875_v50, %v1879_v53  ;;  %v3162_v23 = vcombine.low %v1883_v54, %v1887_v55 }
 0x279   : > { %3999 = vperm.xlu0 %4882, %v3306_v56   ;;  %v3347_v0 = vrot.slane %v3339_v57, %v5361_v13  ;;  %v3163_v1 = vcombine.low %v1891_v58, %v1895_v59  ;;  %v1899_v3 = vrot.slane %v1291_v51, %v5337_v4  ;;  %v1903_v12 = vrot.slane %v1291_v51, %v5340_v5 }
 0x27a   : > { %v3354_v14 = vrot.slane %v3340_v60, %v5361_v13  ;;  %v3170_v15 = vrot.slane %v3160_v61, %v5361_v13  ;;  %v3177_v16 = vrot.slane %v3161_v62, %v5361_v13  ;;  %v3184_v18 = vrot.slane %v3162_v23, %v5361_v13 }
 0x27b   : > { %v3191_v20 = vrot.slane %v3163_v1, %v5361_v13  ;;  %v1907_v21 = vrot.slane %v1291_v51, %v5343_v6  ;;  %v1911_v22 = vrot.slane %v1291_v51, %v5346_v7  ;;  %v1915_v24 = vrot.slane %v1291_v51, %v5349_v8 }
 0x27c   : > { %v3355_v25 = vcombine.low %v3347_v0, %v3354_v14  ;;  %v3192_v26 = vcombine.low %v3170_v15, %v3177_v16  ;;  %v1919_v27 = vrot.slane %v1291_v51, %v5352_v9  ;;  %v1923_v28 = vrot.slane %v1291_v51, %v5355_v10 }
 0x27d   : > { %v3193_v29 = vcombine.low %v3184_v18, %v3191_v20  ;;  %v1927_v30 = vrot.slane %v1291_v51, %v5358_v11  ;;  %v3209_v31 = vcombine.low %v1899_v3, %v1903_v12  ;;  %v3210_v32 = vcombine.low %v1907_v21, %v1911_v22  ;;  %v1297_v12 = vpop.xlane.xlu0 %1296 }
 0x27e   : > { %4002 = vperm.xlu1 %4881, %v3355_v25   ;;  %v3200_v33 = vrot.slane %v3192_v26, %v5361_v13  ;;  %v3211_v34 = vcombine.low %v1915_v24, %v1919_v27  ;;  %v2059_v35 = vrot.slane %v1301_v19, %v5337_v4  ;;  %v2063_v36 = vrot.slane %v1301_v19, %v5340_v5 }
 0x27f   : > { %v3207_v37 = vrot.slane %v3193_v29, %v5361_v13  ;;  %v3212_v38 = vcombine.low %v1923_v28, %v1927_v30  ;;  %v3219_v39 = vrot.slane %v3209_v31, %v5361_v13  ;;  %v3226_v41 = vrot.slane %v3210_v32, %v5361_v13 }
 0x280   : > { %v3233_v43 = vrot.slane %v3211_v34, %v5361_v13  ;;  %v2067_v44 = vrot.slane %v1301_v19, %v5343_v6  ;;  %v2071_v45 = vrot.slane %v1301_v19, %v5346_v7  ;;  %v2075_v46 = vrot.slane %v1301_v19, %v5349_v8 }
 0x281   : > { %v3208_v47 = vcombine.low %v3200_v33, %v3207_v37  ;;  %v3240_v48 = vrot.slane %v3212_v38, %v5361_v13  ;;  %v3241_v49 = vcombine.low %v3219_v39, %v3226_v41  ;;  %v2079_v50 = vrot.slane %v1301_v19, %v5352_v9 }
 0x282   : > { %v2083_v51 = vrot.slane %v1301_v19, %v5355_v10  ;;  %v2087_v52 = vrot.slane %v1301_v19, %v5358_v11  ;;  %v3454_v53 = vcombine.low %v2059_v35, %v2063_v36  ;;  %v3455_v54 = vcombine.low %v2067_v44, %v2071_v45  ;;  %v1299_v36 = vpop.xlane.xlu1 %1298 }
 0x283   : > { %3993 = vperm.xlu0 %4882, %v3208_v47   ;;  %v3242_v55 = vcombine.low %v3233_v43, %v3240_v48  ;;  %v3249_v56 = vrot.slane %v3241_v49, %v5361_v13  ;;  %v3456_v57 = vcombine.low %v2075_v46, %v2079_v50  ;;  %v2091_v58 = vrot.slane %v1303_v42, %v5337_v4 }
 0x284   : > { %v3457_v59 = vcombine.low %v2083_v51, %v2087_v52  ;;  %v3464_v60 = vrot.slane %v3454_v53, %v5361_v13  ;;  %v3471_v61 = vrot.slane %v3455_v54, %v5361_v13  ;;  %v2095_v62 = vrot.slane %v1303_v42, %v5340_v5  ;;  %v1309_v54 = vpop.xlane.xlu0 %1308 }
 0x285   : > { %v3256_v23 = vrot.slane %v3242_v55, %v5361_v13  ;;  %v3478_v0 = vrot.slane %v3456_v57, %v5361_v13  ;;  %v2099_v1 = vrot.slane %v1303_v42, %v5343_v6  ;;  %v2103_v3 = vrot.slane %v1303_v42, %v5346_v7 }
 0x286   : > { %v3485_v14 = vrot.slane %v3457_v59, %v5361_v13  ;;  %v3486_v15 = vcombine.low %v3464_v60, %v3471_v61  ;;  %v2107_v16 = vrot.slane %v1303_v42, %v5349_v8  ;;  %v2111_v18 = vrot.slane %v1303_v42, %v5352_v9 }
 0x287   : > { %v3257_v19 = vcombine.low %v3249_v56, %v3256_v23  ;;  %v2115_v20 = vrot.slane %v1303_v42, %v5355_v10  ;;  %v2119_v21 = vrot.slane %v1303_v42, %v5358_v11  ;;  %v3503_v22 = vcombine.low %v2091_v58, %v2095_v62 }
 0x288   : > { %v3487_v24 = vcombine.low %v3478_v0, %v3485_v14  ;;  %v3494_v25 = vrot.slane %v3486_v15, %v5361_v13  ;;  %v3504_v26 = vcombine.low %v2099_v1, %v2103_v3  ;;  %v3505_v27 = vcombine.low %v2107_v16, %v2111_v18 }
 0x289   : > { %3996 = vperm.xlu1 %4881, %v3257_v19   ;;  %v3506_v28 = vcombine.low %v2115_v20, %v2119_v21  ;;  %v3513_v29 = vrot.slane %v3503_v22, %v5361_v13  ;;  %v1995_v30 = vrot.slane %v1297_v12, %v5337_v4  ;;  %v1999_v31 = vrot.slane %v1297_v12, %v5340_v5 }
 0x28a   : > { %v3501_v32 = vrot.slane %v3487_v24, %v5361_v13  ;;  %v3520_v33 = vrot.slane %v3504_v26, %v5361_v13  ;;  %v3527_v34 = vrot.slane %v3505_v27, %v5361_v13  ;;  %v2003_v35 = vrot.slane %v1297_v12, %v5343_v6  ;;  %v5683_v27 = vpop.xlane.xlu1 %1310 }
 0x28b   : > { %v3534_v37 = vrot.slane %v3506_v28, %v5361_v13  ;;  %v2007_v38 = vrot.slane %v1297_v12, %v5346_v7  ;;  %v2011_v39 = vrot.slane %v1297_v12, %v5349_v8  ;;  %v2015_v41 = vrot.slane %v1297_v12, %v5352_v9  ;;  %v1305_v28 = vpop.xlane.xlu0 %1304 }
 0x28c   : > { %v3502_v42 = vcombine.low %v3494_v25, %v3501_v32  ;;  %v3535_v43 = vcombine.low %v3513_v29, %v3520_v33  ;;  %v2019_v44 = vrot.slane %v1297_v12, %v5355_v10  ;;  %v2023_v45 = vrot.slane %v1297_v12, %v5358_v11 }
 0x28d   : > { %v3536_v46 = vcombine.low %v3527_v34, %v3534_v37  ;;  %v3356_v47 = vcombine.low %v1995_v30, %v1999_v31  ;;  %v3357_v48 = vcombine.low %v2003_v35, %v2007_v38  ;;  %v3358_v49 = vcombine.low %v2011_v39, %v2015_v41 }
 0x28e   : > { %4011 = vperm.xlu0 %4882, %v3502_v42   ;;  %v3543_v50 = vrot.slane %v3535_v43, %v5361_v13  ;;  %v3359_v51 = vcombine.low %v2019_v44, %v2023_v45  ;;  %v2027_v52 = vrot.slane %v1299_v36, %v5337_v4  ;;  %v2031_v53 = vrot.slane %v1299_v36, %v5340_v5 }
 0x28f   : > { %v3550_v55 = vrot.slane %v3536_v46, %v5361_v13  ;;  %v3366_v56 = vrot.slane %v3356_v47, %v5361_v13  ;;  %v3373_v57 = vrot.slane %v3357_v48, %v5361_v13  ;;  %v3380_v58 = vrot.slane %v3358_v49, %v5361_v13 }
 0x290   : > { %v3387_v59 = vrot.slane %v3359_v51, %v5361_v13  ;;  %v2035_v60 = vrot.slane %v1299_v36, %v5343_v6  ;;  %v2039_v61 = vrot.slane %v1299_v36, %v5346_v7  ;;  %v2043_v62 = vrot.slane %v1299_v36, %v5349_v8 }
 0x291   : > { %v3551_v23 = vcombine.low %v3543_v50, %v3550_v55  ;;  %v3388_v0 = vcombine.low %v3366_v56, %v3373_v57  ;;  %v2047_v1 = vrot.slane %v1299_v36, %v5352_v9  ;;  %v2051_v3 = vrot.slane %v1299_v36, %v5355_v10 }
 0x292   : > { %v3389_v12 = vcombine.low %v3380_v58, %v3387_v59  ;;  %v2055_v14 = vrot.slane %v1299_v36, %v5358_v11  ;;  %v3405_v15 = vcombine.low %v2027_v52, %v2031_v53  ;;  %v3406_v16 = vcombine.low %v2035_v60, %v2039_v61 }
 0x293   : > { %4014 = vperm.xlu1 %4881, %v3551_v23   ;;  %v3396_v18 = vrot.slane %v3388_v0, %v5361_v13  ;;  %v3407_v19 = vcombine.low %v2043_v62, %v2047_v1  ;;  %v2187_v20 = vrot.slane %v1309_v54, %v5337_v4  ;;  %v2191_v21 = vrot.slane %v1309_v54, %v5340_v5 }
 0x294   : > { %v3403_v22 = vrot.slane %v3389_v12, %v5361_v13  ;;  %v3408_v24 = vcombine.low %v2051_v3, %v2055_v14  ;;  %v3415_v25 = vrot.slane %v3405_v15, %v5361_v13  ;;  %v3422_v26 = vrot.slane %v3406_v16, %v5361_v13 }
 0x295   : > { %v3429_v29 = vrot.slane %v3407_v19, %v5361_v13  ;;  %v2195_v30 = vrot.slane %v1309_v54, %v5343_v6  ;;  %v2199_v31 = vrot.slane %v1309_v54, %v5346_v7  ;;  %v2203_v32 = vrot.slane %v1309_v54, %v5349_v8 }
 0x296   : > { %v3404_v33 = vcombine.low %v3396_v18, %v3403_v22  ;;  %v3436_v34 = vrot.slane %v3408_v24, %v5361_v13  ;;  %v3437_v35 = vcombine.low %v3415_v25, %v3422_v26  ;;  %v2207_v36 = vrot.slane %v1309_v54, %v5352_v9 }
 0x297   : > { %v2211_v37 = vrot.slane %v1309_v54, %v5355_v10  ;;  %v2215_v38 = vrot.slane %v1309_v54, %v5358_v11  ;;  %v3650_v39 = vcombine.low %v2187_v20, %v2191_v21  ;;  %v3651_v41 = vcombine.low %v2195_v30, %v2199_v31  ;;  %v1307_v54 = vpop.xlane.xlu1 %1306 }
 0x298   : > { %4005 = vperm.xlu0 %4882, %v3404_v33   ;;  %v3438_v42 = vcombine.low %v3429_v29, %v3436_v34  ;;  %v3445_v43 = vrot.slane %v3437_v35, %v5361_v13  ;;  %v3652_v44 = vcombine.low %v2203_v32, %v2207_v36  ;;  %v2123_v45 = vrot.slane %v1305_v28, %v5337_v4 }
 0x299   : > { %v3653_v46 = vcombine.low %v2211_v37, %v2215_v38  ;;  %v3660_v47 = vrot.slane %v3650_v39, %v5361_v13  ;;  %v3667_v48 = vrot.slane %v3651_v41, %v5361_v13  ;;  %v2127_v49 = vrot.slane %v1305_v28, %v5340_v5  ;;  %v5726_v41 = vpop.xlane.xlu0 %1312 }
 0x29a   : > { %v3452_v50 = vrot.slane %v3438_v42, %v5361_v13  ;;  %v3674_v51 = vrot.slane %v3652_v44, %v5361_v13  ;;  %v2131_v52 = vrot.slane %v1305_v28, %v5343_v6  ;;  %v2135_v53 = vrot.slane %v1305_v28, %v5346_v7 }
 0x29b   : > { %v3681_v55 = vrot.slane %v3653_v46, %v5361_v13  ;;  %v3682_v56 = vcombine.low %v3660_v47, %v3667_v48  ;;  %v2139_v57 = vrot.slane %v1305_v28, %v5349_v8  ;;  %v2143_v58 = vrot.slane %v1305_v28, %v5352_v9 }
 0x29c   : > { %v3453_v59 = vcombine.low %v3445_v43, %v3452_v50  ;;  %v2147_v60 = vrot.slane %v1305_v28, %v5355_v10  ;;  %v2151_v61 = vrot.slane %v1305_v28, %v5358_v11  ;;  %v3552_v62 = vcombine.low %v2123_v45, %v2127_v49 }
 0x29d   : > { %v3683_v23 = vcombine.low %v3674_v51, %v3681_v55  ;;  %v3690_v0 = vrot.slane %v3682_v56, %v5361_v13  ;;  %v3553_v1 = vcombine.low %v2131_v52, %v2135_v53  ;;  %v3554_v3 = vcombine.low %v2139_v57, %v2143_v58 }
 0x29e   : > { %4008 = vperm.xlu1 %4881, %v3453_v59   ;;  %v3555_v12 = vcombine.low %v2147_v60, %v2151_v61  ;;  %v3562_v14 = vrot.slane %v3552_v62, %v5361_v13  ;;  %v2155_v15 = vrot.slane %v1307_v54, %v5337_v4  ;;  %v2159_v16 = vrot.slane %v1307_v54, %v5340_v5 }
 0x29f   : > { %v3697_v18 = vrot.slane %v3683_v23, %v5361_v13  ;;  %v3569_v19 = vrot.slane %v3553_v1, %v5361_v13  ;;  %v3576_v20 = vrot.slane %v3554_v3, %v5361_v13  ;;  %v2163_v21 = vrot.slane %v1307_v54, %v5343_v6 }
 0x2a0   : > { %v3583_v22 = vrot.slane %v3555_v12, %v5361_v13  ;;  %v2167_v24 = vrot.slane %v1307_v54, %v5346_v7  ;;  %v2171_v25 = vrot.slane %v1307_v54, %v5349_v8  ;;  %v2175_v26 = vrot.slane %v1307_v54, %v5352_v9 }
 0x2a1   : > { %v3698_v28 = vcombine.low %v3690_v0, %v3697_v18  ;;  %v3584_v29 = vcombine.low %v3562_v14, %v3569_v19  ;;  %v2179_v30 = vrot.slane %v1307_v54, %v5355_v10  ;;  %v2183_v31 = vrot.slane %v1307_v54, %v5358_v11 }
 0x2a2   : > { %v3585_v32 = vcombine.low %v3576_v20, %v3583_v22  ;;  %v3601_v33 = vcombine.low %v2155_v15, %v2159_v16  ;;  %v3602_v34 = vcombine.low %v2163_v21, %v2167_v24  ;;  %v3603_v35 = vcombine.low %v2171_v25, %v2175_v26 }
 0x2a3   : > { %4023 = vperm.xlu0 %4882, %v3698_v28   ;;  %v3592_v36 = vrot.slane %v3584_v29, %v5361_v13  ;;  %v3604_v37 = vcombine.low %v2179_v30, %v2183_v31  ;;  %v2219_v38 = vrot.slane %v5683_v27, %v5337_v4  ;;  %v2223_v39 = vrot.slane %v5683_v27, %v5340_v5 }
 0x2a4   : > { %v3599_v42 = vrot.slane %v3585_v32, %v5361_v13  ;;  %v3611_v43 = vrot.slane %v3601_v33, %v5361_v13  ;;  %v3618_v44 = vrot.slane %v3602_v34, %v5361_v13  ;;  %v3625_v45 = vrot.slane %v3603_v35, %v5361_v13 }
 0x2a5   : > { %v3632_v46 = vrot.slane %v3604_v37, %v5361_v13  ;;  %v2227_v47 = vrot.slane %v5683_v27, %v5343_v6  ;;  %v2231_v48 = vrot.slane %v5683_v27, %v5346_v7  ;;  %v2235_v49 = vrot.slane %v5683_v27, %v5349_v8 }
 0x2a6   : > { %v3600_v50 = vcombine.low %v3592_v36, %v3599_v42  ;;  %v3633_v51 = vcombine.low %v3611_v43, %v3618_v44  ;;  %v2239_v52 = vrot.slane %v5683_v27, %v5352_v9  ;;  %v2243_v53 = vrot.slane %v5683_v27, %v5355_v10 }
 0x2a7   : > { %v3634_v54 = vcombine.low %v3625_v45, %v3632_v46  ;;  %v2247_v55 = vrot.slane %v5683_v27, %v5358_v11  ;;  %v3699_v56 = vcombine.low %v2219_v38, %v2223_v39  ;;  %v3700_v57 = vcombine.low %v2227_v47, %v2231_v48  ;;  %v1317_v27 = vpop.xlane.xlu0 %1316 }
 0x2a8   : > { %4017 = vperm.xlu0 %4882, %v3600_v50   ;;  %v3641_v58 = vrot.slane %v3633_v51, %v5361_v13  ;;  %v3701_v59 = vcombine.low %v2235_v49, %v2239_v52  ;;  %v1803_v60 = vrot.slane %v5503_v17, %v5337_v4  ;;  %v1807_v61 = vrot.slane %v5503_v17, %v5340_v5 }
 0x2a9   : > { %v3648_v62 = vrot.slane %v3634_v54, %v5361_v13  ;;  %v3702_v23 = vcombine.low %v2243_v53, %v2247_v55  ;;  %v3709_v0 = vrot.slane %v3699_v56, %v5361_v13  ;;  %v3716_v1 = vrot.slane %v3700_v57, %v5361_v13  ;;  %v5787_v56 = vpop.xlane.xlu1 %1318 }
 0x2aa   : > { %v3723_v3 = vrot.slane %v3701_v59, %v5361_v13  ;;  %v1811_v12 = vrot.slane %v5503_v17, %v5343_v6  ;;  %v1815_v14 = vrot.slane %v5503_v17, %v5346_v7  ;;  %v1819_v15 = vrot.slane %v5503_v17, %v5349_v8 }
 0x2ab   : > { %v3649_v16 = vcombine.low %v3641_v58, %v3648_v62  ;;  %v3730_v18 = vrot.slane %v3702_v23, %v5361_v13  ;;  %v3731_v19 = vcombine.low %v3709_v0, %v3716_v1  ;;  %v1823_v20 = vrot.slane %v5503_v17, %v5352_v9 }
 0x2ac   : > { %v1827_v21 = vrot.slane %v5503_v17, %v5355_v10  ;;  %v1831_v22 = vrot.slane %v5503_v17, %v5358_v11  ;;  %v3062_v24 = vcombine.low %v1803_v60, %v1807_v61  ;;  %v3063_v25 = vcombine.low %v1811_v12, %v1815_v14 }
 0x2ad   : > { %4020 = vperm.xlu1 %4881, %v3649_v16   ;;  %v3732_v26 = vcombine.low %v3723_v3, %v3730_v18  ;;  %v3739_v28 = vrot.slane %v3731_v19, %v5361_v13  ;;  %v3064_v29 = vcombine.low %v1819_v15, %v1823_v20  ;;  %v2315_v30 = vrot.slane %v1317_v27, %v5337_v4 }
 0x2ae   : > { %v3065_v31 = vcombine.low %v1827_v21, %v1831_v22  ;;  %v3072_v32 = vrot.slane %v3062_v24, %v5361_v13  ;;  %v3079_v33 = vrot.slane %v3063_v25, %v5361_v13  ;;  %v2319_v34 = vrot.slane %v1317_v27, %v5340_v5 }
 0x2af   : > { %v3746_v35 = vrot.slane %v3732_v26, %v5361_v13  ;;  %v3086_v17 = vrot.slane %v3064_v29, %v5361_v13  ;;  %v2323_v36 = vrot.slane %v1317_v27, %v5343_v6  ;;  %v2327_v37 = vrot.slane %v1317_v27, %v5346_v7 }
 0x2b0   : > { %v3093_v38 = vrot.slane %v3065_v31, %v5361_v13  ;;  %v3094_v39 = vcombine.low %v3072_v32, %v3079_v33  ;;  %v2331_v42 = vrot.slane %v1317_v27, %v5349_v8  ;;  %v2335_v43 = vrot.slane %v1317_v27, %v5352_v9 }
 0x2b1   : > { %v3747_v44 = vcombine.low %v3739_v28, %v3746_v35  ;;  %v2339_v45 = vrot.slane %v1317_v27, %v5355_v10  ;;  %v2343_v46 = vrot.slane %v1317_v27, %v5358_v11  ;;  %v3846_v47 = vcombine.low %v2315_v30, %v2319_v34  ;;  %v1315_v28 = vpop.xlane.xlu1 %1314 }
 0x2b2   : > { %v3095_v48 = vcombine.low %v3086_v17, %v3093_v38  ;;  %v3102_v49 = vrot.slane %v3094_v39, %v5361_v13  ;;  %v3847_v50 = vcombine.low %v2323_v36, %v2327_v37  ;;  %v3848_v51 = vcombine.low %v2331_v42, %v2335_v43 }
 0x2b3   : > { %4026 = vperm.xlu0 %4882, %v3747_v44   ;;  %v3849_v52 = vcombine.low %v2339_v45, %v2343_v46  ;;  %v3856_v53 = vrot.slane %v3846_v47, %v5361_v13  ;;  %v1835_v54 = vrot.slane %v5521_v40, %v5337_v4  ;;  %v1839_v55 = vrot.slane %v5521_v40, %v5340_v5 }
 0x2b4   : > { %v3109_v57 = vrot.slane %v3095_v48, %v5361_v13  ;;  %v3863_v58 = vrot.slane %v3847_v50, %v5361_v13  ;;  %v3870_v59 = vrot.slane %v3848_v51, %v5361_v13  ;;  %v1843_v60 = vrot.slane %v5521_v40, %v5343_v6 }
 0x2b5   : > { %v3877_v61 = vrot.slane %v3849_v52, %v5361_v13  ;;  %v1847_v62 = vrot.slane %v5521_v40, %v5346_v7  ;;  %v1851_v23 = vrot.slane %v5521_v40, %v5349_v8  ;;  %v1855_v0 = vrot.slane %v5521_v40, %v5352_v9 }
 0x2b6   : > { %v3110_v1 = vcombine.low %v3102_v49, %v3109_v57  ;;  %v3878_v27 = vcombine.low %v3856_v53, %v3863_v58  ;;  %v1859_v3 = vrot.slane %v5521_v40, %v5355_v10  ;;  %v1863_v12 = vrot.slane %v5521_v40, %v5358_v11 }
 0x2b7   : > { %v3879_v14 = vcombine.low %v3870_v59, %v3877_v61  ;;  %v3111_v15 = vcombine.low %v1835_v54, %v1839_v55  ;;  %v3112_v16 = vcombine.low %v1843_v60, %v1847_v62  ;;  %v3113_v18 = vcombine.low %v1851_v23, %v1855_v0 }
 0x2b8   : > { %3987 = vperm.xlu1 %4881, %v3110_v1   ;;  %v3886_v19 = vrot.slane %v3878_v27, %v5361_v13  ;;  %v3114_v20 = vcombine.low %v1859_v3, %v1863_v12  ;;  %v2251_v21 = vrot.slane %v5726_v41, %v5337_v4  ;;  %v2255_v22 = vrot.slane %v5726_v41, %v5340_v5 }
 0x2b9   : > { %v3893_v24 = vrot.slane %v3879_v14, %v5361_v13  ;;  %v3121_v25 = vrot.slane %v3111_v15, %v5361_v13  ;;  %v3128_v40 = vrot.slane %v3112_v16, %v5361_v13  ;;  %v3135_v26 = vrot.slane %v3113_v18, %v5361_v13 }
 0x2ba   : > { %v3142_v29 = vrot.slane %v3114_v20, %v5361_v13  ;;  %v2259_v30 = vrot.slane %v5726_v41, %v5343_v6  ;;  %v2263_v31 = vrot.slane %v5726_v41, %v5346_v7  ;;  %v2267_v32 = vrot.slane %v5726_v41, %v5349_v8 }
 0x2bb   : > { %v3894_v33 = vcombine.low %v3886_v19, %v3893_v24  ;;  %v3143_v34 = vcombine.low %v3121_v25, %v3128_v40  ;;  %v2271_v35 = vrot.slane %v5726_v41, %v5352_v9  ;;  %v2275_v17 = vrot.slane %v5726_v41, %v5355_v10 }
 0x2bc   : > { %v3144_v36 = vcombine.low %v3135_v26, %v3142_v29  ;;  %v2279_v37 = vrot.slane %v5726_v41, %v5358_v11  ;;  %v3748_v38 = vcombine.low %v2251_v21, %v2255_v22  ;;  %v3749_v39 = vcombine.low %v2259_v30, %v2263_v31 }
 0x2bd   : > { %4035 = vperm.xlu0 %4882, %v3894_v33   ;;  %v3151_v42 = vrot.slane %v3143_v34, %v5361_v13  ;;  %v3750_v43 = vcombine.low %v2267_v32, %v2271_v35  ;;  %v2283_v44 = vrot.slane %v1315_v28, %v5337_v4  ;;  %v2287_v45 = vrot.slane %v1315_v28, %v5340_v5 }
 0x2be   : > { %v3158_v46 = vrot.slane %v3144_v36, %v5361_v13  ;;  %v3751_v47 = vcombine.low %v2275_v17, %v2279_v37  ;;  %v3758_v48 = vrot.slane %v3748_v38, %v5361_v13  ;;  %v3765_v49 = vrot.slane %v3749_v39, %v5361_v13  ;;  %v4329_v17 = vpop.f32.mrf.mxu0 }
 0x2bf   : > { %v3772_v50 = vrot.slane %v3750_v43, %v5361_v13  ;;  %v2291_v41 = vrot.slane %v1315_v28, %v5343_v6  ;;  %v2295_v51 = vrot.slane %v1315_v28, %v5346_v7  ;;  %v2299_v52 = vrot.slane %v1315_v28, %v5349_v8 }
 0x2c0   : > { %v3159_v53 = vcombine.low %v3151_v42, %v3158_v46  ;;  %v3779_v54 = vrot.slane %v3751_v47, %v5361_v13  ;;  %v3780_v55 = vcombine.low %v3758_v48, %v3765_v49  ;;  %v2303_v57 = vrot.slane %v1315_v28, %v5352_v9  ;;  %v4331_v36 = vpop.f32.mrf.mxu0  ;;  %v5872_v42 = vpop.permute.xlu1 %3951 }
 0x2c1   : > { %v2307_v58 = vrot.slane %v1315_v28, %v5355_v10  ;;  %v2311_v59 = vrot.slane %v1315_v28, %v5358_v11  ;;  %v3797_v60 = vcombine.low %v2283_v44, %v2287_v45  ;;  %v3798_v61 = vcombine.low %v2291_v41, %v2295_v51 }
 0x2c2   : > { %3990 = vperm.xlu1 %4881, %v3159_v53   ;;  %v3781_v62 = vcombine.low %v3772_v50, %v3779_v54  ;;  %v3788_v23 = vrot.slane %v3780_v55, %v5361_v13  ;;  %v3799_v0 = vcombine.low %v2299_v52, %v2303_v57  ;;  %v2347_v1 = vrot.slane %v5787_v56, %v5337_v4 }
 0x2c3   : > { %v3800_v27 = vcombine.low %v2307_v58, %v2311_v59  ;;  %v3807_v3 = vrot.slane %v3797_v60, %v5361_v13  ;;  %v3814_v12 = vrot.slane %v3798_v61, %v5361_v13  ;;  %v2351_v14 = vrot.slane %v5787_v56, %v5340_v5 }
 0x2c4   : > { %v3795_v15 = vrot.slane %v3781_v62, %v5361_v13  ;;  %v3821_v16 = vrot.slane %v3799_v0, %v5361_v13  ;;  %v2355_v18 = vrot.slane %v5787_v56, %v5343_v6  ;;  %v2359_v19 = vrot.slane %v5787_v56, %v5346_v7  ;;  %v5893_v46 = vpop.permute.xlu1 %3954 }
 0x2c5   : > { %v3828_v4 = vrot.slane %v3800_v27, %v5361_v13  ;;  %v3829_v20 = vcombine.low %v3807_v3, %v3814_v12  ;;  %v2363_v21 = vrot.slane %v5787_v56, %v5349_v8  ;;  %v2367_v22 = vrot.slane %v5787_v56, %v5352_v9 }
 0x2c6   : > { %v3796_v5 = vcombine.low %v3788_v23, %v3795_v15  ;;  %v2371_v24 = vrot.slane %v5787_v56, %v5355_v10  ;;  %v2375_v25 = vrot.slane %v5787_v56, %v5358_v11  ;;  %v3895_v6 = vcombine.low %v2347_v1, %v2351_v14 }
 0x2c7   : > { %v3830_v40 = vcombine.low %v3821_v16, %v3828_v4  ;;  %v3837_v7 = vrot.slane %v3829_v20, %v5361_v13  ;;  %v3896_v26 = vcombine.low %v2355_v18, %v2359_v19  ;;  %v3897_v28 = vcombine.low %v2363_v21, %v2367_v22 }
 0x2c8   : > { %4029 = vperm.xlu0 %4882, %v3796_v5   ;;  %v3898_v29 = vcombine.low %v2371_v24, %v2375_v25  ;;  %v3905_v8 = vrot.slane %v3895_v6, %v5361_v13  ;;  %v4334_v37 = vmul.f32 0.00390625, %v4329_v17  ;;  %v4335_v38 = vmul.f32 0.00390625, %v4331_v36 }
 0x2c9   : > { %v3844_v9 = vrot.slane %v3830_v40, %v5361_v13  ;;  %v3912_v30 = vrot.slane %v3896_v26, %v5361_v13  ;;  %v3919_v10 = vrot.slane %v3897_v28, %v5361_v13 }
 0x2ca   : > { %v3926_v31 = vrot.slane %v3898_v29, %v5361_v13  ;;  %v4338_v39 = vcombine.low %v4334_v37, %v4335_v38 }
 0x2cb   : > { %v3845_v11 = vcombine.low %v3837_v7, %v3844_v9  ;;  %v3927_v56 = vcombine.low %v3905_v8, %v3912_v30 }
 0x2cc   : > { %v3928_v32 = vcombine.low %v3919_v10, %v3926_v31  ;;  %v4345_v43 = vrot.slane %v4338_v39, %v5361_v13 }
 0x2cd   : > { %4032 = vperm.xlu0 %4882, %v3845_v11   ;;  %v3935_v33 = vrot.slane %v3927_v56, %v5361_v13 }
 0x2ce   : > { %v3942_v34 = vrot.slane %v3928_v32, %v5361_v13  ;;  %v4352_v45 = vrot.slane %v4345_v43, %v5361_v13 }
 0x2d0   : > { %v3943_v35 = vcombine.low %v3935_v33, %v3942_v34  ;;  %4354 = vst.msk [vmem:[%s308_s10] sm:$0x3] %vm5879_vm2, %v4352_v45 }
 0x2d2   : > { %4038 = vperm.xlu0 %4882, %v3943_v35  }
 0x2d3   : > { %4974 = shalt.err (!%p4971_p1)
}
 0x2d4   : > { %s4975_s9 = scalar_lea.hbm %s5889_s6, 32  ;;  %s4979_s21 = scalar_lea.hbm %s6053_s4, 64 }
 0x2d5   : > { %p4976_p10 = scmp.ne.s32.totalorder %s5889_s6, %s4975_s9  ;;  %p4980_p8 = scmp.lt.s32.totalorder %s5889_s6, %s6053_s4 }
 0x2d6   : > { %p4981_p0 = scmp.lt.s32.totalorder %s4979_s21, %s4975_s9 }
 0x2d7   : > { %p4977_p13 = pnand %p4976_p10, %p5164_p9 }
 0x2d8   : > { %p4982_p2 = por %p4981_p0, %p4980_p8 }
 0x2d9   : > { %p4978_p3 = pneg %p4977_p13 }
 0x2db   : > { %p4983_p5 = pnand %p4982_p2, %p4978_p3 }
 0x2dd   : > { %4986 = shalt.err (!%p4983_p5)
}
 0x2de   : > { %4807 = dma.vmem_to_hbm [thread:$0]  (%p5164_p9), %s4394_s12, 32, %s5889_s6, %s4361_s7   ;;  %v3949_v47 = vpop.permute.xlu1 %3948  ;;  %v3946_v53 = vpop.permute.xlu0 %3945  ;;  %v5933_v23 = vand.u32 127, %v1352_v63  ;;  %vm4051_vm3 = vcmask 130112   ;;  %vm4058_vm4 = vcmask 195712   ;;  %vm4065_vm5 = vcmask 261312  }
 0x2df   : > { %vm4072_vm6 = vcmask 326912   ;;  %vm4079_vm7 = vcmask 392512   ;;  %vm4086_vm8 = vcmask 458112   ;;  %vm4093_vm9 = vcmask 523712   ;;  %s301_s12 = scalar_lea.vmem [#allocation9], %s4563_s24  ;;  %s4375_s7 = scalar_lea.hbm %s6052_s3, %s4692_s25 }
 0x2e0   : > { %v4046_v0 = vadd.s32 4294967288, %v5933_v23  ;;  %v4053_v12 = vadd.s32 4294967280, %v5933_v23  ;;  %v4044_v14 = vsub.s32 %v5933_v23, %v5334_v2  ;;  %v4060_v19 = vadd.s32 4294967272, %v5933_v23  ;;  %s4377_s14 = sshll.u32 %s301_s12, 4  ;;  %s4356_s8 = scalar_lea.sflag [#allocation6], %s5221_s5  ;;  %s4378_s14 = int_to_ptr.vmem [resolvable:$true] %s4377_s14 }
 0x2e1   : > { %v4067_v20 = vadd.s32 4294967264, %v5933_v23  ;;  %v4074_v21 = vadd.s32 4294967256, %v5933_v23  ;;  %v4081_v29 = vadd.s32 4294967248, %v5933_v23  ;;  %v4088_v33 = vadd.s32 4294967240, %v5933_v23  ;;  %s4987_s23 = scalar_lea.vmem %s4378_s14, 32  ;;  %s5087_s24 = smov [#allocation9]  }
 0x2e2   : > { %v5912_v48 = vpop.permute.xlu1 %3963  ;;  %v5926_v55 = vpop.permute.xlu0 %3972  ;;  %v4049_v3 = vsub.s32 %v4046_v0, %v5334_v2  ;;  %v4056_v63 = vsub.s32 %v4053_v12, %v5334_v2  ;;  %v4063_v24 = vsub.s32 %v4060_v19, %v5334_v2  ;;  %v4045_v28 = vrot.slane %v3946_v53, %v4044_v14  ;;  %p4988_p6 = scmp.ne.s32.totalorder %s4378_s14, %s4987_s23  ;;  %s4991_s0 = sshll.u32 %s5087_s24, 4  ;;  %s4992_s0 = int_to_ptr.vmem [resolvable:$false] %s4991_s0 }
 0x2e3   : > { %v4070_v6 = vsub.s32 %v4067_v20, %v5334_v2  ;;  %v4077_v8 = vsub.s32 %v4074_v21, %v5334_v2  ;;  %v4084_v32 = vsub.s32 %v4081_v29, %v5334_v2  ;;  %v4095_v17 = vadd.s32 4294967232, %v5933_v23  ;;  %s4993_s13 = scalar_lea.vmem %s4992_s0, 64  ;;  %p4994_p1 = scmp.lt.s32.totalorder %s4378_s14, %s4992_s0 }
 0x2e4   : > { %v4050_v25 = vrot.slane %v3949_v47, %v4049_v3  ;;  %v4057_v56 = vrot.slane %v5872_v42, %v4056_v63  ;;  %v4064_v38 = vrot.slane %v5893_v46, %v4063_v24  ;;  %v4102_v42 = vadd.s32 4294967224, %v5933_v23  ;;  %p4989_p4 = pnand %p4988_p6, %p5164_p9  ;;  %p4995_p10 = scmp.lt.s32.totalorder %s4993_s13, %s4987_s23 }
 0x2e5   : > { %v4091_v53 = vsub.s32 %v4088_v33, %v5334_v2  ;;  %vm4100_vm10 = vcmask 589312   ;;  %v4130_v20 = vadd.s32 4294967192, %v5933_v23  ;;  %vm4107_vm11 = vcmask 654912  }
 0x2e6   : > { %v5914_v49 = vpop.permute.xlu1 %3957  ;;  %v4052_v10 = vsel %vm4051_vm3, %v4050_v25, %v4045_v28  ;;  %v4105_v0 = vsub.s32 %v4102_v42, %v5334_v2  ;;  %vm4114_vm12 = vcmask 720512   ;;  %vm4121_vm13 = vcmask 786112   ;;  %p4990_p7 = pneg %p4989_p4  ;;  %p4996_p13 = por %p4995_p10, %p4994_p1 }
 0x2e7   : > { %v4059_v34 = vsel %vm4058_vm4, %v4057_v56, %v4052_v10  ;;  %v4071_v35 = vrot.slane %v5914_v49, %v4070_v6  ;;  %v4133_v29 = vsub.s32 %v4130_v20, %v5334_v2  ;;  %vm4128_vm14 = vcmask 851712  }
 0x2e8   : > { %v4066_v47 = vsel %vm4065_vm5, %v4064_v38, %v4059_v34  ;;  %vm4135_vm15 = vcmask 917312   ;;  %vm4142_vm0 = vcmask 982912   ;;  %vm4149_vm1 = vcmask 1048512   ;;  %p4997_p3 = pnand %p4996_p13, %p4990_p7 }
 0x2e9   : > { %v4073_v49 = vsel %vm4072_vm6, %v4071_v35, %v4066_v47 }
 0x2ea   : > { %v5916_v50 = vpop.permute.xlu1 %3966 }
 0x2ee   : > { %v5918_v41 = vpop.permute.xlu1 %3960 }
 0x2ef   : > { %v4078_v39 = vrot.slane %v5918_v41, %v4077_v8 }
 0x2f1   : > { %v4080_v41 = vsel %vm4079_vm7, %v4078_v39, %v4073_v49 }
 0x2f2   : > { %v5920_v51 = vpop.permute.xlu1 %3975 }
 0x2f4   : > { %v4000_v58 = vpop.permute.xlu0 %3999 }
 0x2f5   : > { %v4163_v5 = vrot.slane %v4000_v58, %v4056_v63  ;;  %v4098_v58 = vsub.s32 %v4095_v17, %v5334_v2  ;;  %v4123_v63 = vadd.s32 4294967200, %v5933_v23 }
 0x2f6   : > { %v5922_v52 = vpop.permute.xlu1 %3969 }
 0x2fa   : > { %v5924_v54 = vpop.permute.xlu1 %3978 }
 0x2fe   : > { %v5928_v57 = vpop.permute.xlu1 %3981  ;;  %v3994_v60 = vpop.permute.xlu0 %3993 }
 0x2ff   : > { %v4154_v4 = vrot.slane %v3994_v60, %v4044_v14 }
 0x302   : > { %v5930_v59 = vpop.permute.xlu1 %3984 }
 0x306   : > { %v4003_v61 = vpop.permute.xlu1 %4002 }
 0x307   : > { %v4168_v9 = vrot.slane %v4003_v61, %v4063_v24 }
 0x309   : > { %v4012_v62 = vpop.permute.xlu0 %4011 }
 0x30a   : > { %v3997_v1 = vpop.permute.xlu1 %3996  ;;  %v4183_v45 = vrot.slane %v4012_v62, %v4084_v32  ;;  %v4085_v62 = vrot.slane %v5912_v48, %v4084_v32  ;;  %v4106_v48 = vrot.slane %v5926_v55, %v4105_v0 }
 0x30b   : > { %v4158_v15 = vrot.slane %v3997_v1, %v4049_v3 }
 0x30c   : > { %v4087_v19 = vsel %vm4086_vm8, %v4085_v62, %v4080_v41 }
 0x30d   : > { %v4159_v22 = vsel %vm4051_vm3, %v4158_v15, %v4154_v4  ;;  %v4092_v15 = vrot.slane %v5916_v50, %v4091_v53  ;;  %v4099_v4 = vrot.slane %v5922_v52, %v4098_v58 }
 0x30e   : > { %v4015_v16 = vpop.permute.xlu1 %4014  ;;  %v4164_v40 = vsel %vm4058_vm4, %v4163_v5, %v4159_v22  ;;  %v4137_v5 = vadd.s32 4294967184, %v5933_v23 }
 0x30f   : > { %v4169_v31 = vsel %vm4065_vm5, %v4168_v9, %v4164_v40  ;;  %v4188_v1 = vrot.slane %v4015_v16, %v4091_v53  ;;  %v4116_v16 = vadd.s32 4294967208, %v5933_v23  ;;  %v4094_v25 = vsel %vm4093_vm9, %v4092_v15, %v4087_v19 }
 0x310   : > { %v4101_v40 = vsel %vm4100_vm10, %v4099_v4, %v4094_v25 }
 0x311   : > { %v4108_v28 = vsel %vm4107_vm11, %v4106_v48, %v4101_v40 }
 0x313   : > { %v4006_v27 = vpop.permute.xlu0 %4005 }
 0x314   : > { %v4173_v30 = vrot.slane %v4006_v27, %v4070_v6  ;;  %v4109_v27 = vadd.s32 4294967216, %v5933_v23  ;;  %v4144_v6 = vadd.s32 4294967176, %v5933_v23 }
 0x316   : > { %v4174_v36 = vsel %vm4072_vm6, %v4173_v30, %v4169_v31  ;;  %v4112_v21 = vsub.s32 %v4109_v27, %v5334_v2  ;;  %v4140_v30 = vsub.s32 %v4137_v5, %v5334_v2  ;;  %v4147_v23 = vsub.s32 %v4144_v6, %v5334_v2 }
 0x319   : > { %v4009_v7 = vpop.permute.xlu1 %4008 }
 0x31a   : > { %v4178_v11 = vrot.slane %v4009_v7, %v4077_v8  ;;  %v4126_v7 = vsub.s32 %v4123_v63, %v5334_v2  ;;  %v4113_v8 = vrot.slane %v5920_v51, %v4112_v21  ;;  %v4134_v51 = vrot.slane %v5930_v59, %v4133_v29 }
 0x31c   : > { %v4179_v43 = vsel %vm4079_vm7, %v4178_v11, %v4174_v36  ;;  %v4115_v56 = vsel %vm4114_vm12, %v4113_v8, %v4108_v28 }
 0x31d   : > { %v4184_v60 = vsel %vm4086_vm8, %v4183_v45, %v4179_v43 }
 0x31e   : > { %v5940_v18 = vpop.permute.xlu0 %4023  ;;  %v4189_v12 = vsel %vm4093_vm9, %v4188_v1, %v4184_v60 }
 0x31f   : > { %v4203_v55 = vrot.slane %v5940_v18, %v4112_v21  ;;  %v4127_v18 = vrot.slane %v5928_v57, %v4126_v7 }
 0x323   : > { %v4018_v26 = vpop.permute.xlu0 %4017 }
 0x324   : > { %v4193_v3 = vrot.slane %v4018_v26, %v4098_v58  ;;  %v4119_v26 = vsub.s32 %v4116_v16, %v5334_v2 }
 0x326   : > { %v4194_v22 = vsel %vm4100_vm10, %v4193_v3, %v4189_v12  ;;  %v4120_v34 = vrot.slane %v5924_v54, %v4119_v26 }
 0x328   : > { %v4021_v61 = vpop.permute.xlu1 %4020 }
 0x329   : > { %v4198_v14 = vrot.slane %v4021_v61, %v4105_v0 }
 0x32b   : > { %v4199_v52 = vsel %vm4107_vm11, %v4198_v14, %v4194_v22 }
 0x32c   : > { %v4204_v9 = vsel %vm4114_vm12, %v4203_v55, %v4199_v52 }
 0x32e   : > { %v5961_v37 = vpop.permute.xlu0 %4026 }
 0x32f   : > { %v4208_v31 = vrot.slane %v5961_v37, %v4119_v26  ;;  %v4122_v37 = vsel %vm4121_vm13, %v4120_v34, %v4115_v56 }
 0x330   : > { %v4129_v39 = vsel %vm4128_vm14, %v4127_v18, %v4122_v37 }
 0x331   : > { %v4209_v35 = vsel %vm4121_vm13, %v4208_v31, %v4204_v9  ;;  %v4136_v54 = vsel %vm4135_vm15, %v4134_v51, %v4129_v39 }
 0x333   : > { %v3988_v50 = vpop.permute.xlu1 %3987 }
 0x334   : > { %v4141_v17 = vrot.slane %v3988_v50, %v4140_v30 }
 0x336   : > { %v4143_v59 = vsel %vm4142_vm0, %v4141_v17, %v4136_v54 }
 0x338   : > { %v5972_v46 = vpop.permute.xlu0 %4035 }
 0x339   : > { %v4223_v57 = vrot.slane %v5972_v46, %v4140_v30 }
 0x33d   : > { %v3991_v32 = vpop.permute.xlu1 %3990 }
 0x33e   : > { %v4148_v2 = vrot.slane %v3991_v32, %v4147_v23 }
 0x340   : > { %v4150_v47 = vsel %vm4149_vm1, %v4148_v2, %v4143_v59 }
 0x343   : > { %v4030_v24 = vpop.permute.xlu0 %4029 }
 0x344   : > { %v4213_v10 = vrot.slane %v4030_v24, %v4126_v7 }
 0x346   : > { %v4214_v36 = vsel %vm4128_vm14, %v4213_v10, %v4209_v35 }
 0x348   : > { %v4033_v11 = vpop.permute.xlu0 %4032 }
 0x349   : > { %v4218_v33 = vrot.slane %v4033_v11, %v4133_v29 }
 0x34b   : > { %v4219_v38 = vsel %vm4135_vm15, %v4218_v33, %v4214_v36 }
 0x34c   : > { %v4224_v45 = vsel %vm4142_vm0, %v4223_v57, %v4219_v38 }
 0x34d   : > { %v4039_v42 = vpop.permute.xlu0 %4038 }
 0x34e   : > { %v4228_v43 = vrot.slane %v4039_v42, %v4147_v23 }
 0x350   : > { %v4229_v53 = vsel %vm4149_vm1, %v4228_v43, %v4224_v45 }
 0x351   : > { %v4230_v49 = vcombine.low %v4150_v47, %v4229_v53 }
 0x353   : > { %v4237_v58 = vrot.slane %v4230_v49, %v5361_v13 }
 0x355   : > { %v4244_v60 = vrot.slane %v4237_v58, %v5361_v13 }
 0x357   : > { %4250 = vst.msk [vmem:[%s301_s12] sm:$0x3] %vm5879_vm2, %v4244_v60 }
 0x358   : > { %5000 = shalt.err (!%p4997_p3)
}
 0x359   : > { %s5001_s18 = scalar_lea.hbm %s4375_s7, 32  ;;  %s5005_s9 = scalar_lea.hbm %s6052_s3, 64 }
 0x35a   : > { %p5002_p8 = scmp.ne.s32.totalorder %s4375_s7, %s5001_s18  ;;  %p5006_p5 = scmp.lt.s32.totalorder %s4375_s7, %s6052_s3 }
 0x35b   : > { %p5007_p6 = scmp.lt.s32.totalorder %s5005_s9, %s5001_s18 }
 0x35c   : > { %p5003_p0 = pnand %p5002_p8, %p5164_p9 }
 0x35d   : > { %p5008_p4 = por %p5007_p6, %p5006_p5 }
 0x35e   : > { %p5004_p2 = pneg %p5003_p0 }
 0x360   : > { %p5009_p12 = pnand %p5008_p4, %p5004_p2 }
 0x362   : > { %5012 = shalt.err (!%p5009_p12)
}
 0x363   : > { %4806 = dma.vmem_to_hbm [thread:$0]  (%p5164_p9), %s4378_s14, 32, %s4375_s7, %s4356_s8  }
 0x364 PF: > { %s4405_s21 = sand.u32 1, %s5055_s15   ;;  %p6066_p7 = scmp.ge.s32.totalorder %s5075_s20, 2 }
 0x365   : > { %s4406_s22 = scalar_lea.sflag [#allocation6], %s4405_s21 }
 0x366   : > { %p4818_p1 = pnand %p6066_p7, %p5171_p11 }
 0x368   : > { %p4819_p10 = pneg %p4818_p1 }
 0x36a   : > { %5046 = dma.done.wait (%p4819_p10), %s4406_s22, 32  }
 0x36b   : > { %5048 = vsyncadd (%p4819_p10), %s4406_s22, 4294967264  ;;  %s4415_s10 = scalar_lea.sflag [#allocation11], %s4405_s21 }
 0x36c   : > { %5050 = dma.done.wait (%p4819_p10), %s4415_s10, 32  }
 0x36d   : > { %5052 = vsyncadd (%p4819_p10), %s4415_s10, 4294967264  ;;  %s27_s20 = sadd.s32 1, %s5075_s20   ;;  %s6067_s28 = sld [smem:[#allocation16_spill]] }
 0x36e   : > { %p24_p12 = scmp.ge.s32.totalorder %s27_s20, 4   ;;  %s6068_s15 = smov %s5059_s16 }
 0x36f   : > { %s6069_s16 = smov %s5063_s17  ;;  %s6070_s17 = smov %s5169_s29 }
 0x370   : > { %s6071_s18 = smov %s5071_s19  ;;  %26 = sbr.rel (!%p24_p12) target bundleno = 12 (0xc), region = 118 }
 0x373   : > { %s6072_s19 = smov %s6067_s28 }
 0x375   :  { %4420 = vsyncpa [#allocation5], 1 }
 0x376   :  { %4422 = vsyncpa [#allocation5 + $0x1], 1 }
 0x377   :  { %4423 = vsyncpa [#allocation8], 1 }
 0x378   :  { %4425 = vsyncpa [#allocation8 + $0x1], 1 }
 0x379   :  { %4426 = vsyncpa [#allocation6], 1 }
 0x37a   :  { %4428 = vsyncpa [#allocation6 + $0x1], 1 }
 0x37b   :  { %4429 = vsyncpa [#allocation11], 1 }
 0x37c   :  { %4431 = vsyncpa [#allocation11 + $0x1], 1 }

</bundles_post_ra>
